<compile_context>
chip_gen: v5e
topology: v5e:2x2
jax: 0.10.0
libtpu: 0.0.40
codegen_flags: <defaults>
</compile_context>

<pallas_src>
import functools

import jax
import jax.numpy as jnp
from jax.experimental import pallas as pl
from jax.experimental.pallas import tpu as pltpu


def _round_up(x, m):
    return ((x + m - 1) // m) * m


def _vmem_capacity_bytes():
    try:
        return int(pltpu.get_tpu_info().vmem_capacity_bytes)
    except Exception:
        return 64 * 1024 * 1024  # conservative (v7x-sized) fallback


def _pick_block_b(B):
    """Batch tile: prefer 256/512-row tiles (fill the 256x256 MXU on v6e/v7x
    and amortize the ~0.35us per-grid-step overhead), keep >=2 grid steps so
    v7x's two TensorCores can both be used, and pick a divisor of B so the
    wrapper never needs an extra HBM pass to pad x."""
    for cand in (512, 256, 128):
        if B % cand == 0 and B // cand >= 2:
            return cand
    if B > 512:
        return 256          # ragged large batch: wrapper pads x to 256 rows
    return B                # small batch: one full-size block (full-dims rule)


def _resident_spec(block_shape):
    """Weight/bias spec: constant index_map => DMA'd once, resident across
    grid steps. Single-buffered when the installed jax supports pipeline_mode
    (a second copy of a resident weight is pure VMEM waste)."""
    index_map = lambda i: (0, 0)
    try:
        return pl.BlockSpec(block_shape, index_map, pipeline_mode=pl.Buffered(1))
    except Exception:
        return pl.BlockSpec(block_shape, index_map)


def _mlp_kernel(x_ref, w1_ref, b1_ref, w2_ref, b2_ref, out_ref, hid_ref):
    # fc: x @ W1 on the MXU. x arrives f32 (no wrapper cast pass); the bf16
    # cast is a VPU op hidden under the pipeline DMAs. Accumulation is f32.
    h = jnp.dot(x_ref[...].astype(jnp.bfloat16), w1_ref[...],
                preferred_element_type=jnp.float32)
    h = jnp.maximum(h + b1_ref[...], 0.0)          # (bm, L) + (1, L) broadcast
    hid_ref[...] = h.astype(hid_ref.dtype)         # x_internal (f32)
    # TODO(synk): opt-in bf16 x_internal would halve the dominant HBM write,
    # but changes dtype semantics vs the f32 PyTorch module, so it stays f32.

    # lastfc: relu(h) @ W2 + b2 (hidden re-cast to bf16 for the MXU, f32 acc).
    o = jnp.dot(h.astype(w2_ref.dtype), w2_ref[...],
                preferred_element_type=jnp.float32)
    out_ref[...] = (o + b2_ref[...]).astype(out_ref.dtype)


def prepare_net_one_params(w1, b1, w2, b2):
    """Pad + bf16-cast the static weights ONCE, outside the per-call path.

    Args (nn.Linear weights already transposed to [in, out]):
      w1: (input_size, length) f32,  b1: (length,) f32
      w2: (length, class_num) f32,   b2: (class_num,) f32
    Returns (padded_params, meta) to feed net_one_forward.
    """
    in_size, length = w1.shape
    class_num = w2.shape[1]
    L_pad = _round_up(length, 128)      # lane-dense hidden stores
    C_pad = _round_up(class_num, 128)   # lane-dense output stores
    w1_p = jnp.pad(w1, ((0, 0), (0, L_pad - length))).astype(jnp.bfloat16)
    b1_p = jnp.pad(b1, (0, L_pad - length)).reshape(1, L_pad).astype(jnp.float32)
    w2_p = jnp.pad(w2, ((0, L_pad - length),
                        (0, C_pad - class_num))).astype(jnp.bfloat16)
    b2_p = jnp.pad(b2, (0, C_pad - class_num)).reshape(1, C_pad).astype(jnp.float32)
    meta = {"length": int(length), "class_num": int(class_num)}
    return (w1_p, b1_p, w2_p, b2_p), meta


@functools.partial(jax.jit, static_argnames=("block_b", "length", "class_num"))
def _net_one_pallas(x, w1_p, b1_p, w2_p, b2_p, *, block_b, length, class_num):
    B, in_size = x.shape
    L_pad = w1_p.shape[1]
    C_pad = w2_p.shape[1]

    # Batch padding only when block_b does not divide B (the block picker
    # avoids this whenever possible, so x normally skips the extra HBM pass).
    B_pad = _round_up(B, block_b)
    if B_pad != B:
        x = jnp.pad(x, ((0, B_pad - B), (0, 0)))

    grid = (B_pad // block_b,)

    out_shapes = (
        jax.ShapeDtypeStruct((B_pad, C_pad), jnp.float32),   # output (padded)
        jax.ShapeDtypeStruct((B_pad, L_pad), jnp.float32),   # x_internal
    )

    # Advisory cost hint so XLA schedules neighbors around the custom call.
    flops = 2 * B_pad * (in_size * L_pad + L_pad * C_pad)
    bytes_accessed = (B_pad * in_size * 4                      # x (f32)
                      + (in_size * L_pad + L_pad * C_pad) * 2  # bf16 weights
                      + (L_pad + C_pad) * 4                    # f32 biases
                      + B_pad * (C_pad + L_pad) * 4)           # f32 outputs
    cost = pl.CostEstimate(flops=int(flops), transcendentals=0,
                           bytes_accessed=int(bytes_accessed))

    # Scoped-VMEM request: per-step tiles (double-buffered) + resident weights
    # (conservatively counted double-buffered) + in-kernel temporaries
    # (bf16 x cast, f32 hidden, bf16 hidden recast). Cap at 75% of physical
    # VMEM (v7x: 48 of 64 MiB; v5e/v6e: 96 of 128 MiB) to leave headroom for
    # compiler-internal scratch.
    vmem_need = (
        2 * block_b * in_size * 4
        + 2 * block_b * (L_pad + C_pad) * 4
        + 2 * ((in_size * L_pad + L_pad * C_pad) * 2 + (L_pad + C_pad) * 4)
        + block_b * (in_size * 2 + L_pad * (4 + 2))
    )
    cap = _vmem_capacity_bytes()
    vmem_limit = int(min(max(32 * 1024 * 1024, vmem_need * 3 // 2),
                         cap * 3 // 4))

    # TODO(synk): if in_size grows toward real image sizes (>~8K), add a K
    # grid axis with an f32 accumulator scratch instead of keeping W1 fully
    # VMEM-resident (bf16 W1 alone would exceed v7x VMEM).

    out_pad, hid_pad = pl.pallas_call(
        _mlp_kernel,
        out_shape=out_shapes,
        grid_spec=pltpu.PrefetchScalarGridSpec(
            num_scalar_prefetch=0,
            grid=grid,
            in_specs=[
                pl.BlockSpec((block_b, in_size), lambda i: (i, 0)),
                _resident_spec((in_size, L_pad)),
                _resident_spec((1, L_pad)),
                _resident_spec((L_pad, C_pad)),
                _resident_spec((1, C_pad)),
            ],
            out_specs=[
                pl.BlockSpec((block_b, C_pad), lambda i: (i, 0)),
                pl.BlockSpec((block_b, L_pad), lambda i: (i, 0)),
            ],
        ),
        compiler_params=pltpu.CompilerParams(
            dimension_semantics=("parallel",),
            vmem_limit_bytes=vmem_limit),
        cost_estimate=cost,
    )(x, w1_p, b1_p, w2_p, b2_p)

    # Slice only what was actually padded, so x_internal (the dominant array)
    # is returned with no extra HBM copy when B_pad == B and L_pad == length.
    output = out_pad
    if B_pad != B or C_pad != class_num:
        output = out_pad[:B, :class_num]
    x_internal = hid_pad
    if B_pad != B or L_pad != length:
        x_internal = hid_pad[:B, :length]
    return output, x_internal


def net_one_forward(x, padded_params, meta, *, block_b=None):
    """Net_one.forward: x_internal = relu(x@W1+b1); output = x_internal@W2+b2.

    x: (B, input_size) f32 (torch x.view(B, -1) flattening of NCHW).
    padded_params, meta: from prepare_net_one_params (pad/cast done once).
    """
    if block_b is None:
        block_b = _pick_block_b(int(x.shape[0]))
    return _net_one_pallas(x, *padded_params, block_b=int(block_b),
                           length=meta["length"], class_num=meta["class_num"])


def init_linear_params(key, in_features, out_features):
    """Deterministic nn.Linear-style init: U(-1/sqrt(fan_in), 1/sqrt(fan_in)).
    Returns weight already transposed to (in_features, out_features)."""
    kw, kb = jax.random.split(key)
    bound = 1.0 / jnp.sqrt(jnp.float32(in_features))
    w = jax.random.uniform(kw, (in_features, out_features), jnp.float32,
                           -bound, bound)
    b = jax.random.uniform(kb, (out_features,), jnp.float32, -bound, bound)
    return w, b


if __name__ == "__main__":
    # Small shapes consistent with Net_one(length, input_size, class_num).
    # B=256 -> block_b=128, a 2-step grid (pipelining; both v7x TCs engaged);
    # length=256 (multiple of 128) and B%block_b==0 -> x is never padded and
    # x_internal is returned without a slice copy.
    B, C, H, W = 256, 3, 16, 16
    input_size = C * H * W      # 768
    length = 256
    class_num = 10

    key = jax.random.PRNGKey(0)
    k_img, k_fc, k_last = jax.random.split(key, 3)

    # NCHW image flattened to (B, input_size), matching torch layout.
    img = jax.random.normal(k_img, (B, C, H, W), jnp.float32)
    x = img.reshape(B, input_size)

    w1, b1 = init_linear_params(k_fc, input_size, length)      # fc
    w2, b2 = init_linear_params(k_last, length, class_num)     # lastfc

    padded_params, meta = prepare_net_one_params(w1, b1, w2, b2)

    output, x_internal = net_one_forward(x, padded_params, meta)
    jax.block_until_ready((output, x_internal))

    # Pure-JAX f32 reference (same math as the PyTorch forward). Tolerances
    # account for bf16 MXU inputs with f32 accumulation.
    hid_ref = jnp.maximum(x @ w1 + b1, 0.0)
    out_ref = hid_ref @ w2 + b2
    assert output.shape == (B, class_num)
    assert x_internal.shape == (B, length)
    assert jnp.allclose(x_internal, hid_ref, atol=5e-2, rtol=5e-2)
    assert jnp.allclose(output, out_ref, atol=5e-2, rtol=5e-2)

    print("KERNEL_OK")
</pallas_src>

<mosaic_0001>
module attributes {stable_mosaic.version = 11 : i64} {
  func.func @_mlp_kernel(%arg0: i32, %arg1: memref<128x768xf32, #tpu.memory_space<vmem>>, %arg2: memref<768x256xbf16, #tpu.memory_space<vmem>>, %arg3: memref<1x256xf32, #tpu.memory_space<vmem>>, %arg4: memref<256x128xbf16, #tpu.memory_space<vmem>>, %arg5: memref<1x128xf32, #tpu.memory_space<vmem>>, %arg6: memref<128x128xf32, #tpu.memory_space<vmem>>, %arg7: memref<128x256xf32, #tpu.memory_space<vmem>>) attributes {dimension_semantics = [#tpu.dimension_semantics<parallel>], iteration_bounds = array<i64: 2>, scalar_prefetch = 0 : i64, scratch_operands = 0 : i64, tpu.core_type = #tpu.core_type<tc>, window_params = [{transform_indices = @transform_0, window_bounds = array<i64: 128, 768>}, {pipeline_mode = #tpu.pipeline_mode<synchronous>, transform_indices = @transform_1, window_bounds = array<i64: 768, 256>}, {pipeline_mode = #tpu.pipeline_mode<synchronous>, transform_indices = @transform_2, window_bounds = array<i64: 1, 256>}, {pipeline_mode = #tpu.pipeline_mode<synchronous>, transform_indices = @transform_3, window_bounds = array<i64: 256, 128>}, {pipeline_mode = #tpu.pipeline_mode<synchronous>, transform_indices = @transform_4, window_bounds = array<i64: 1, 128>}, {transform_indices = @transform_5, window_bounds = array<i64: 128, 128>}, {transform_indices = @transform_6, window_bounds = array<i64: 128, 256>}]} {
    %c0 = arith.constant 0 : index
    %c0_0 = arith.constant 0 : index
    %0 = vector.load %arg1[%c0, %c0_0] : memref<128x768xf32, #tpu.memory_space<vmem>>, vector<128x768xf32>
    %1 = arith.truncf %0 : vector<128x768xf32> to vector<128x768xbf16>
    %c0_1 = arith.constant 0 : index
    %c0_2 = arith.constant 0 : index
    %2 = vector.load %arg2[%c0_1, %c0_2] : memref<768x256xbf16, #tpu.memory_space<vmem>>, vector<768x256xbf16>
    %cst = arith.constant dense<0.000000e+00> : vector<128x256xf32>
    %3 = tpu.matmul %1, %2, %cst {dimension_numbers = #tpu.dot_dimension_numbers<[1], [0], [0], [1], [0, 0, 1, 1], [], []>} : vector<128x768xbf16>, vector<768x256xbf16>, vector<128x256xf32> -> vector<128x256xf32>
    %c0_3 = arith.constant 0 : index
    %c0_4 = arith.constant 0 : index
    %4 = vector.load %arg3[%c0_3, %c0_4] : memref<1x256xf32, #tpu.memory_space<vmem>>, vector<1x256xf32>
    %5 = vector.broadcast %4 : vector<1x256xf32> to vector<128x256xf32>
    %6 = arith.addf %3, %5 : vector<128x256xf32>
    %cst_5 = arith.constant 0.000000e+00 : f32
    %7 = vector.broadcast %cst_5 : f32 to vector<128x256xf32>
    %8 = arith.maximumf %6, %7 : vector<128x256xf32>
    %c0_6 = arith.constant 0 : index
    %c0_7 = arith.constant 0 : index
    %9 = vector.load %arg7[%c0_6, %c0_7] : memref<128x256xf32, #tpu.memory_space<vmem>>, vector<128x256xf32>
    tpu.vector_store %arg7[%c0_6, %c0_7], %8 {strides = array<i32>} : memref<128x256xf32, #tpu.memory_space<vmem>>, vector<128x256xf32>,
    %10 = arith.truncf %8 : vector<128x256xf32> to vector<128x256xbf16>
    %c0_8 = arith.constant 0 : index
    %c0_9 = arith.constant 0 : index
    %11 = vector.load %arg4[%c0_8, %c0_9] : memref<256x128xbf16, #tpu.memory_space<vmem>>, vector<256x128xbf16>
    %cst_10 = arith.constant dense<0.000000e+00> : vector<128x128xf32>
    %12 = tpu.matmul %10, %11, %cst_10 {dimension_numbers = #tpu.dot_dimension_numbers<[1], [0], [0], [1], [0, 0, 1, 1], [], []>} : vector<128x256xbf16>, vector<256x128xbf16>, vector<128x128xf32> -> vector<128x128xf32>
    %c0_11 = arith.constant 0 : index
    %c0_12 = arith.constant 0 : index
    %13 = vector.load %arg5[%c0_11, %c0_12] : memref<1x128xf32, #tpu.memory_space<vmem>>, vector<1x128xf32>
    %14 = vector.broadcast %13 : vector<1x128xf32> to vector<128x128xf32>
    %15 = arith.addf %12, %14 : vector<128x128xf32>
    %c0_13 = arith.constant 0 : index
    %c0_14 = arith.constant 0 : index
    %16 = vector.load %arg6[%c0_13, %c0_14] : memref<128x128xf32, #tpu.memory_space<vmem>>, vector<128x128xf32>
    tpu.vector_store %arg6[%c0_13, %c0_14], %15 {strides = array<i32>} : memref<128x128xf32, #tpu.memory_space<vmem>>, vector<128x128xf32>,
    return
  }
  func.func @transform_0(%arg0: i32) -> (i32, i32) {
    %c0_i32 = arith.constant 0 : i32
    %c0_i32_0 = arith.constant 0 : i32
    return %arg0, %c0_i32 : i32, i32
  }
  func.func @transform_1(%arg0: i32) -> (i32, i32) {
    %c0_i32 = arith.constant 0 : i32
    %c0_i32_0 = arith.constant 0 : i32
    %c0_i32_1 = arith.constant 0 : i32
    return %c0_i32, %c0_i32_0 : i32, i32
  }
  func.func @transform_2(%arg0: i32) -> (i32, i32) {
    %c0_i32 = arith.constant 0 : i32
    %c0_i32_0 = arith.constant 0 : i32
    %c0_i32_1 = arith.constant 0 : i32
    return %c0_i32, %c0_i32_0 : i32, i32
  }
  func.func @transform_3(%arg0: i32) -> (i32, i32) {
    %c0_i32 = arith.constant 0 : i32
    %c0_i32_0 = arith.constant 0 : i32
    %c0_i32_1 = arith.constant 0 : i32
    return %c0_i32, %c0_i32_0 : i32, i32
  }
  func.func @transform_4(%arg0: i32) -> (i32, i32) {
    %c0_i32 = arith.constant 0 : i32
    %c0_i32_0 = arith.constant 0 : i32
    %c0_i32_1 = arith.constant 0 : i32
    return %c0_i32, %c0_i32_0 : i32, i32
  }
  func.func @transform_5(%arg0: i32) -> (i32, i32) {
    %c0_i32 = arith.constant 0 : i32
    %c0_i32_0 = arith.constant 0 : i32
    return %arg0, %c0_i32 : i32, i32
  }
  func.func @transform_6(%arg0: i32) -> (i32, i32) {
    %c0_i32 = arith.constant 0 : i32
    %c0_i32_0 = arith.constant 0 : i32
    return %arg0, %c0_i32 : i32, i32
  }
}

</mosaic_0001>

<bundles_post_ra>
// kernel: _net_one_pallas.1
= control target key start
LH: loop header
LB: loop body
LE: loop exit
PB: predicated region body
PF: predicated region fallthrough
CT: control target
= control target key end

     0   :  { %s3775_s0 = inlined_call_operand.hbm [shape: f32[256,768], index: 0, kind: input, shape index: {}]   ;;  %s3776_s1 = inlined_call_operand.hbm [shape: bf16[768,256], index: 1, kind: input, shape index: {}]   ;;  %s3777_s2 = inlined_call_operand.hbm [shape: f32[1,256], index: 2, kind: input, shape index: {}]   ;;  %s3778_s3 = inlined_call_operand.hbm [shape: bf16[256,128], index: 3, kind: input, shape index: {}]   ;;  %s3779_s4 = inlined_call_operand.vmem [shape: f32[1,128], index: 4, kind: input, shape index: {}]   ;;  %s3780_s5 = inlined_call_operand.vmem [shape: f32[256,128], index: 5, kind: output, shape index: {0}]   ;;  %s3781_s6 = inlined_call_operand.hbm [shape: f32[256,256], index: 6, kind: output, shape index: {1}]  }
   0x1   :  { %3802 = sst [smem:[#allocation38_spill]] %s3776_s1 }
   0x2   :  { %3803 = sst [smem:[#allocation39_spill]] %s3777_s2 }
   0x3   :  { %12 = vsyncpa [#allocation3], 0 }
   0x4   :  { %14 = vsyncpa [#allocation3 + $0x1], 0 }
   0x5   :  { %15 = vsyncpa [#allocation6], 0 }
   0x6   :  { %16 = vsyncpa [#allocation9], 0 }
   0x7   :  { %17 = vsyncpa [#allocation4], 0 }
   0x8   :  { %19 = vsyncpa [#allocation4 + $0x1], 0  ;;  %s3061_s21 = smov 0   ;;  %s3063_s22 = smov 0  }
   0x9   :  { %s3065_s23 = smov 0   ;;  %s3067_s24 = smov 0  }
   0xa LB: > { %s3082_s25 = sadd.s32 4294967295, %s3013_s24   ;;  %s2130_s26 = sadd.s32 4294967294, %s3013_s24   ;;  %s3013_s24 = sphi %s3067_s24, %s3862_s24   ;;  %s3009_s23 = sphi %s3065_s23, %s3861_s23   ;;  %s3005_s22 = sphi %s3063_s22, %s3860_s22   ;;  %s3001_s21 = sphi %s3061_s21, %s3859_s21  }
   0xb   : > { %p45_p0 = scmp.ne.s32.totalorder %s3005_s22, %s3001_s21  ;;  %p46_p1 = scmp.eq.s32.totalorder %s3082_s25, 0 }
   0xc   : > { %p179_p2 = scmp.eq.s32.totalorder %s3082_s25, 1  ;;  %p185_p3 = scmp.eq.s32.totalorder %s2130_s26, 1 }
   0xd   : > { %p3091_p4 = por %p46_p1, %p45_p0  ;;  %p2131_p5 = scmp.ge.s32.totalorder %s3013_s24, 1 }
   0xe   : > { %p3096_p6 = por %p185_p3, %p45_p0  ;;  %p192_p7 = scmp.lt.s32.totalorder %s3013_s24, 3 }
   0xf   : > { %s3806_s1 = sld [smem:[#allocation38_spill]]  ;;  %s3015_s9 = smov [#allocation5]  }
  0x10   : > { %p3104_p8 = pnand %p2131_p5, %p192_p7  ;;  %s205_s10 = sshll.u32 %s3015_s9, 4  ;;  %s206_s10 = int_to_ptr.vmem [resolvable:$true] %s205_s10 }
  0x11   : > { %s3809_s2 = sld [smem:[#allocation39_spill]]  ;;  %s3016_s15 = smov 128  }
  0x12   : > { %p2749_p9 = pneg %p3104_p8  ;;  %s3017_s16 = smov 8  }
  0x13   : > { %s3018_s17 = smov [#allocation7]   ;;  %s229_s26 = sshll.u32 %s3778_s3, 4  ;;  %s230_s26 = int_to_ptr.hbm [resolvable:$true] %s229_s26 }
  0x14   : > { %p3112_p10 = pnand %p2749_p9, %p46_p1  ;;  %s220_s18 = sshll.u32 %s3018_s17, 4  ;;  %s221_s18 = int_to_ptr.vmem [resolvable:$true] %s220_s18 }
  0x15   : > { %s203_s7 = sshll.u32 %s3806_s1, 4  ;;  %s3019_s29 = smov [#allocation8]   ;;  %s204_s7 = int_to_ptr.hbm [resolvable:$true] %s203_s7 }
  0x16   : > { %2752 = dma.hbm_to_vmem [thread:$0]  (!%p3112_p10), %s204_s7, 12288, %s206_s10, [#allocation6], %s3016_s15, %s3016_s15, %s3017_s16  }
  0x17   : > { %s218_s14 = sshll.u32 %s3809_s2, 4  ;;  %s231_s30 = sshll.u32 %s3019_s29, 4  ;;  %s219_s14 = int_to_ptr.hbm [resolvable:$true] %s218_s14  ;;  %s232_s30 = int_to_ptr.vmem [resolvable:$true] %s231_s30 }
  0x18   : > { %2755 = dma.hbm_to_vmem [thread:$0]  (!%p3112_p10), %s219_s14, 32, %s221_s18, [#allocation6]  }
  0x19   : > { %s3020_s7 = smov 64   ;;  %s3021_s9 = smov 4  }
  0x1a   : > { %2758 = dma.hbm_to_vmem [thread:$0]  (!%p3112_p10), %s230_s26, 2048, %s232_s30, [#allocation9], %s3020_s7, %s3020_s7, %s3021_s9  }
  0x1b   : > { %s3130_s10 = sadd.s32 1, %s3013_s24   ;;  %s32_s13 = sadd.s32 1, %s3009_s23 }
  0x1c   : > { %s29_s12 = ssub.s32 %s3013_s24, %s3130_s10  ;;  %p39_p13 = scmp.ne.s32.totalorder %s3009_s23, %s3005_s22 }
  0x1d   : > { %p30_p12 = scmp.eq.s32.totalorder %s29_s12, 0  ;;  %p40_p0 = scmp.eq.s32.totalorder %s3013_s24, 0 }
  0x1e   : > { %p2770_p3 = scmp.lt.s32.totalorder %s3013_s24, 2  ;;  %p3144_p7 = por %p179_p2, %p39_p13 }
  0x1f   : > { %s3140_s14 = scalar_select %p30_p12, %s3009_s23, %s32_s13  }
  0x20   : > { %p41_p5 = por %p40_p0, %p39_p13  ;;  %s248_s16 = sand.u32 1, %s3009_s23  }
  0x21   : > { %s2731_s11 = smul.u32 768, %s3013_s24  ;;  %s249_s9 = scalar_lea.sflag [#allocation3], %s248_s16 }
  0x22   : > { %s2730_s17 = smul.u32 768, %s248_s16  ;;  %p3153_p9 = pnand %p2770_p3, %p41_p5 }
  0x23   : > { %s258_s20 = scalar_lea.hbm %s3775_s0, %s2731_s11  ;;  %s2916_s19 = scalar_lea.hbm %s3775_s0, 1536 }
  0x24   : > { %s259_s29 = sshll.u32 %s258_s20, 4  ;;  %s252_s30 = scalar_lea.vmem [#allocation2], %s2730_s17  ;;  %s260_s29 = int_to_ptr.hbm [resolvable:$true] %s259_s29 }
  0x25   : > { %s261_s7 = sshll.u32 %s252_s30, 4  ;;  %s2909_s12 = sshra.s32 %s260_s29, 4  ;;  %s262_s7 = int_to_ptr.vmem [resolvable:$true] %s261_s7  ;;  %s2910_s12 = int_to_ptr.hbm [resolvable:$true] %s2909_s12 }
  0x26   : > { %s2911_s13 = scalar_lea.hbm %s2910_s12, 768  ;;  %p2913_p10 = pneg %p3153_p9 }
  0x27   : > { %p2912_p2 = scmp.ne.s32.totalorder %s2910_s12, %s2911_s13  ;;  %p2917_p0 = scmp.lt.s32.totalorder %s2910_s12, %s3775_s0 }
  0x28   : > { %p2918_p3 = scmp.lt.s32.totalorder %s2916_s19, %s2911_s13 }
  0x29   : > { %p2914_p12 = pnand %p2913_p10, %p2912_p2 }
  0x2a   : > { %p2919_p5 = por %p2918_p3, %p2917_p0 }
  0x2b   : > { %p2915_p13 = pneg %p2914_p12 }
  0x2d   : > { %p2920_p11 = pnand %p2919_p5, %p2915_p13 }
  0x2f   : > { %2923 = shalt.err (!%p2920_p11)
}
  0x30   : > { %s3022_s16 = smov 768   ;;  %s3023_s17 = smov 48  }
  0x31   : > { %2762 = dma.hbm_to_vmem [thread:$0]  (!%p3153_p9), %s260_s29, 12288, %s262_s7, %s249_s9, %s3022_s16, %s3022_s16, %s3023_s17  }
  0x32   : > { %273 = sbr.rel (%p3104_p8) target bundleno = 815 (0x32f), region = 40 }
  0x37   : > { %s3170_s20 = sand.u32 1, %s3005_s22  }
  0x38   : > { %s2732_s1 = smul.u32 768, %s3170_s20  ;;  %s276_s2 = scalar_lea.sflag [#allocation3], %s3170_s20 }
  0x3a   : > { %s3174_s30 = scalar_lea.vmem [#allocation2], %s2732_s1 }
  0x3b   : > { %2984 = dma.done.wait (%p3091_p4), %s276_s2, 12288  }
  0x3c   : > { %2986 = vsyncadd (%p3091_p4), %s276_s2, 4294955008 }
  0x3d   : > { %2988 = dma.done.wait (%p46_p1), [#allocation6], 12320  }
  0x3e   : > { %2990 = vsyncadd (%p46_p1), [#allocation6], 4294954976 }
  0x3f   : > { %2992 = dma.done.wait (%p46_p1), [#allocation9], 2048  }
  0x40   : > { %2994 = vsyncadd (%p46_p1), [#allocation9], 4294965248  ;;  %v2204_v0 = vld [vmem:[#allocation5 + $0x70] sm:$0xf]  ;;  %v2615_v1 = vld [vmem:[#allocation5 + $0x74] sm:$0xf0] }
  0x41   : > { %v2268_v2 = vld [vmem:[#allocation5 + $0xf0] sm:$0xf]  ;;  %v2205_v3 = vor.u32 %v2615_v1, %v2204_v0  ;;  %v2631_v4 = vld [vmem:[#allocation5 + $0xf4] sm:$0xf0]  ;;  %v2196_v5 = vld [vmem:[#allocation5 + $0x60] sm:$0xf] }
  0x42   : > { %v2613_v6 = vld [vmem:[#allocation5 + $0x64] sm:$0xf0]  ;;  %v2269_v7 = vor.u32 %v2631_v4, %v2268_v2  ;;  %v2260_v8 = vld [vmem:[#allocation5 + $0xe0] sm:$0xf]  ;;  %v2188_v12 = vld [vmem:[#allocation5 + $0x50] sm:$0xf] }
  0x43   : > { %v2629_v9 = vld [vmem:[#allocation5 + $0xe4] sm:$0xf0]  ;;  %1063 = vmatpush.bf16.msra.mxu0 %v2205_v3  ;;  %2714 = vmatpush.bf16.msra.mxu2 %v2205_v3  ;;  %v2197_v10 = vor.u32 %v2613_v6, %v2196_v5  ;;  %v2611_v13 = vld [vmem:[#allocation5 + $0x54] sm:$0xf0]  ;;  %v2252_v14 = vld [vmem:[#allocation5 + $0xd0] sm:$0xf] }
  0x44   : > { %2722 = vmatpush.bf16.msra.mxu3 %v2269_v7  ;;  %v2261_v11 = vor.u32 %v2629_v9, %v2260_v8  ;;  %1112 = vmatpush.bf16.msra.mxu1 %v2269_v7  ;;  %v2627_v15 = vld [vmem:[#allocation5 + $0xd4] sm:$0xf0]  ;;  %v2189_v16 = vor.u32 %v2611_v13, %v2188_v12  ;;  %v2180_v18 = vld [vmem:[#allocation5 + $0x40] sm:$0xf]  ;;  %v2609_v19 = vld [vmem:[#allocation5 + $0x44] sm:$0xf0] }
  0x45   : > { %v2253_v17 = vor.u32 %v2627_v15, %v2252_v14  ;;  %v2244_v20 = vld [vmem:[#allocation5 + $0xc0] sm:$0xf]  ;;  %v2625_v21 = vld [vmem:[#allocation5 + $0xc4] sm:$0xf0]  ;;  %v2181_v22 = vor.u32 %v2609_v19, %v2180_v18  ;;  %v2172_v24 = vld [vmem:[#allocation5 + $0x30] sm:$0xf] }
  0x46   : > { %v2245_v23 = vor.u32 %v2625_v21, %v2244_v20  ;;  %v2607_v25 = vld [vmem:[#allocation5 + $0x34] sm:$0xf0]  ;;  %v2236_v26 = vld [vmem:[#allocation5 + $0xb0] sm:$0xf]  ;;  %v2164_v30 = vld [vmem:[#allocation5 + $0x20] sm:$0xf] }
  0x47   : > { %1064 = vmatpush.bf16.msra.mxu0 %v2197_v10  ;;  %2715 = vmatpush.bf16.msra.mxu2 %v2197_v10  ;;  %v2623_v27 = vld [vmem:[#allocation5 + $0xb4] sm:$0xf0]  ;;  %v2173_v28 = vor.u32 %v2607_v25, %v2172_v24  ;;  %v2605_v31 = vld [vmem:[#allocation5 + $0x24] sm:$0xf0]  ;;  %v2228_v32 = vld [vmem:[#allocation5 + $0xa0] sm:$0xf] }
  0x48   : > { %2723 = vmatpush.bf16.msra.mxu3 %v2261_v11  ;;  %1113 = vmatpush.bf16.msra.mxu1 %v2261_v11  ;;  %v2237_v29 = vor.u32 %v2623_v27, %v2236_v26  ;;  %v2621_v33 = vld [vmem:[#allocation5 + $0xa4] sm:$0xf0]  ;;  %v2165_v34 = vor.u32 %v2605_v31, %v2164_v30  ;;  %v2156_v36 = vld [vmem:[#allocation5 + $0x10] sm:$0xf]  ;;  %v2603_v37 = vld [vmem:[#allocation5 + $0x14] sm:$0xf0] }
  0x49   : > { %v2229_v35 = vor.u32 %v2621_v33, %v2228_v32  ;;  %v2220_v38 = vld [vmem:[#allocation5 + $0x90] sm:$0xf]  ;;  %v2619_v39 = vld [vmem:[#allocation5 + $0x94] sm:$0xf0]  ;;  %v2157_v40 = vor.u32 %v2603_v37, %v2156_v36  ;;  %v2148_v42 = vld [vmem:[#allocation5] sm:$0xf] }
  0x4a   : > { %v2221_v41 = vor.u32 %v2619_v39, %v2220_v38  ;;  %v2601_v43 = vld [vmem:[#allocation5 + $0x4] sm:$0xf0]  ;;  %v2212_v44 = vld [vmem:[#allocation5 + $0x80] sm:$0xf]  ;;  %v2332_v46 = vld [vmem:[#allocation5 + $0x170] sm:$0xf] }
  0x4b   : > { %1065 = vmatpush.bf16.msra.mxu0 %v2189_v16  ;;  %2716 = vmatpush.bf16.msra.mxu2 %v2189_v16  ;;  %v2617_v45 = vld [vmem:[#allocation5 + $0x84] sm:$0xf0]  ;;  %v2647_v47 = vld [vmem:[#allocation5 + $0x174] sm:$0xf0]  ;;  %v337_v48 = vld [vmem:[%s3174_s30] sm:$0xff]  ;;  %v2149_v51 = vor.u32 %v2601_v43, %v2148_v42  ;;  %s2143_s27 = sshll.u32 %s3170_s20, 8 }
  0x4c   : > { %2724 = vmatpush.bf16.msra.mxu3 %v2253_v17  ;;  %1114 = vmatpush.bf16.msra.mxu1 %v2253_v17  ;;  %v2396_v49 = vld [vmem:[#allocation5 + $0x1f0] sm:$0xf]  ;;  %v2663_v50 = vld [vmem:[#allocation5 + $0x1f4] sm:$0xf0]  ;;  %v385_v53 = vld [vmem:[%s3174_s30 + $0x180] sm:$0xff]  ;;  %v2213_v55 = vor.u32 %v2617_v45, %v2212_v44  ;;  %v2333_v58 = vor.u32 %v2647_v47, %v2332_v46  ;;  %s3502_s8 = scalar_lea.vmem [#allocation10], %s2143_s27 }
  0x4d   : > { %v343_v52 = vld [vmem:[%s3174_s30 + $0x30] sm:$0xff]  ;;  %v386_v56 = vld [vmem:[%s3174_s30 + $0x188] sm:$0xff]  ;;  %v392_v57 = vld [vmem:[%s3174_s30 + $0x1b8] sm:$0xff]  ;;  %v2397_v60 = vor.u32 %v2663_v50, %v2396_v49  ;;  %s2144_s26 = sshll.u32 %s3082_s25, 4  ;;  %s2713_s29 = sshll.u32 %s3082_s25, 8 }
  0x4e   : > { %v391_v54 = vld [vmem:[%s3174_s30 + $0x1b0] sm:$0xff]  ;;  %v2324_v59 = vld [vmem:[#allocation5 + $0x160] sm:$0xf]  ;;  %v2645_v61 = vld [vmem:[#allocation5 + $0x164] sm:$0xf0]  ;;  %v3196_v0 = vpack.c.bf16 %v343_v52, %v337_v48  ;;  %v3200_v4 = vpack.c.bf16 %v392_v57, %v386_v56  ;;  %p331_p1 = scmp.lt.s32.totalorder %s2144_s26, 31  ;;  %s1999_s12 = scalar_lea.hbm %s3781_s6, %s2713_s29 }
  0x4f   : > { %1066 = vmatpush.bf16.msra.mxu0 %v2181_v22  ;;  %2717 = vmatpush.bf16.msra.mxu2 %v2181_v22  ;;  %v338_v62 = vld [vmem:[%s3174_s30 + $0x8] sm:$0xff]  ;;  %v344_v63 = vld [vmem:[%s3174_s30 + $0x38] sm:$0xff]  ;;  %v3198_v1 = vpack.c.bf16 %v391_v54, %v385_v53  ;;  %v2388_v2 = vld [vmem:[#allocation5 + $0x1e0] sm:$0xf]  ;;  %v2325_v5 = vor.u32 %v2645_v61, %v2324_v59  ;;  %s2000_s13 = sshll.u32 %s3502_s8, 4  ;;  %s2002_s11 = sshll.u32 %s1999_s12, 4  ;;  %s2001_s13 = int_to_ptr.vmem [resolvable:$true] %s2000_s13  ;;  %s2003_s11 = int_to_ptr.hbm [resolvable:$true] %s2002_s11 }
  0x50   : > { %2725 = vmatpush.bf16.msra.mxu3 %v2245_v23  ;;  %1115 = vmatpush.bf16.msra.mxu1 %v2245_v23  ;;  %v2661_v3 = vld [vmem:[#allocation5 + $0x1e4] sm:$0xf0]  ;;  %v3202_v6 = vpack.c.bf16 %v344_v63, %v338_v62  ;;  %v2316_v7 = vld [vmem:[#allocation5 + $0x150] sm:$0xf]  ;;  %v2643_v9 = vld [vmem:[#allocation5 + $0x154] sm:$0xf0] }
  0x51   : > { %v2389_v8 = vor.u32 %v2661_v3, %v2388_v2  ;;  %v2460_v10 = vld [vmem:[#allocation5 + $0x270] sm:$0xf]  ;;  %v2679_v11 = vld [vmem:[#allocation5 + $0x274] sm:$0xf0]  ;;  %v2317_v15 = vor.u32 %v2643_v9, %v2316_v7  ;;  %v2452_v16 = vld [vmem:[#allocation5 + $0x260] sm:$0xf] }
  0x52   : > { %v2380_v12 = vld [vmem:[#allocation5 + $0x1d0] sm:$0xf]  ;;  %v2659_v13 = vld [vmem:[#allocation5 + $0x1d4] sm:$0xf0]  ;;  %v2461_v14 = vor.u32 %v2679_v11, %v2460_v10  ;;  %v2677_v17 = vld [vmem:[#allocation5 + $0x264] sm:$0xf0] }
  0x53   : > { %1067 = vmatpush.bf16.msra.mxu0 %v2173_v28  ;;  %2718 = vmatpush.bf16.msra.mxu2 %v2173_v28  ;;  %v2381_v18 = vor.u32 %v2659_v13, %v2380_v12  ;;  %v2308_v19 = vld [vmem:[#allocation5 + $0x140] sm:$0xf]  ;;  %v2641_v20 = vld [vmem:[#allocation5 + $0x144] sm:$0xf0]  ;;  %v2453_v22 = vor.u32 %v2677_v17, %v2452_v16  ;;  %v2444_v24 = vld [vmem:[#allocation5 + $0x250] sm:$0xf] }
  0x54   : > { %2726 = vmatpush.bf16.msra.mxu3 %v2237_v29  ;;  %1116 = vmatpush.bf16.msra.mxu1 %v2237_v29  ;;  %v2372_v21 = vld [vmem:[#allocation5 + $0x1c0] sm:$0xf]  ;;  %v2657_v23 = vld [vmem:[#allocation5 + $0x1c4] sm:$0xf0]  ;;  %v2675_v25 = vld [vmem:[#allocation5 + $0x254] sm:$0xf0]  ;;  %v2309_v26 = vor.u32 %v2641_v20, %v2308_v19 }
  0x55   : > { %v2524_v27 = vld [vmem:[#allocation5 + $0x2f0] sm:$0xf]  ;;  %v2695_v28 = vld [vmem:[#allocation5 + $0x2f4] sm:$0xf0]  ;;  %v349_v29 = vld [vmem:[%s3174_s30 + $0x60] sm:$0xff]  ;;  %v2373_v30 = vor.u32 %v2657_v23, %v2372_v21  ;;  %s3864_s26 = smov (!%p331_p1, %s2144_s26), 31 }
  0x56   : > { %v2300_v31 = vld [vmem:[#allocation5 + $0x130] sm:$0xf]  ;;  %v2639_v32 = vld [vmem:[#allocation5 + $0x134] sm:$0xf0]  ;;  %v2436_v37 = vld [vmem:[#allocation5 + $0x240] sm:$0xf] }
  0x57   : > { %1068 = vmatpush.bf16.msra.mxu0 %v2165_v34  ;;  %2719 = vmatpush.bf16.msra.mxu2 %v2165_v34  ;;  %v2364_v33 = vld [vmem:[#allocation5 + $0x1b0] sm:$0xf]  ;;  %v2445_v34 = vor.u32 %v2675_v25, %v2444_v24  ;;  %v2655_v36 = vld [vmem:[#allocation5 + $0x1b4] sm:$0xf0]  ;;  %v2673_v38 = vld [vmem:[#allocation5 + $0x244] sm:$0xf0]  ;;  %v2301_v45 = vor.u32 %v2639_v32, %v2300_v31 }
  0x58   : > { %2727 = vmatpush.bf16.msra.mxu3 %v2229_v35  ;;  %1117 = vmatpush.bf16.msra.mxu1 %v2229_v35  ;;  %v2525_v35 = vor.u32 %v2695_v28, %v2524_v27  ;;  %v355_v39 = vld [vmem:[%s3174_s30 + $0x90] sm:$0xff]  ;;  %v398_v42 = vld [vmem:[%s3174_s30 + $0x1e8] sm:$0xff]  ;;  %v404_v43 = vld [vmem:[%s3174_s30 + $0x218] sm:$0xff]  ;;  %v2365_v47 = vor.u32 %v2655_v36, %v2364_v33  ;;  %v2437_v50 = vor.u32 %v2673_v38, %v2436_v37  ;;  %s2145_s16 = sshll.u32 %s3864_s26, 3  ;;  %s1983_s17 = scalar_lea.sflag [#allocation4], %s3170_s20 }
  0x59   : > { %v350_v44 = vld [vmem:[%s3174_s30 + $0x68] sm:$0xff]  ;;  %v356_v46 = vld [vmem:[%s3174_s30 + $0x98] sm:$0xff]  ;;  %v2292_v48 = vld [vmem:[#allocation5 + $0x120] sm:$0xf]  ;;  %s2953_s1 = sshra.s32 %s2003_s11, 4  ;;  %s2959_s27 = scalar_lea.hbm %s3781_s6, 512  ;;  %s2954_s1 = int_to_ptr.hbm [resolvable:$true] %s2953_s1 }
  0x5a   : > { %v2637_v49 = vld [vmem:[#allocation5 + $0x124] sm:$0xf0]  ;;  %v2356_v53 = vld [vmem:[#allocation5 + $0x1a0] sm:$0xf]  ;;  %v3222_v56 = vpack.c.bf16 %v356_v46, %v350_v44  ;;  %v2428_v59 = vld [vmem:[#allocation5 + $0x230] sm:$0xf]  ;;  %p2960_p9 = scmp.lt.s32.totalorder %s2954_s1, %s3781_s6 }
  0x5b   : > { %1069 = vmatpush.bf16.msra.mxu0 %v2157_v40  ;;  %2720 = vmatpush.bf16.msra.mxu2 %v2157_v40  ;;  %v397_v40 = vld [vmem:[%s3174_s30 + $0x1e0] sm:$0xff]  ;;  %v2653_v54 = vld [vmem:[#allocation5 + $0x1a4] sm:$0xf0]  ;;  %v2293_v57 = vor.u32 %v2637_v49, %v2292_v48  ;;  %v2284_v2 = vld [vmem:[#allocation5 + $0x110] sm:$0xf]  ;;  %s2955_s2 = scalar_lea.hbm %s2954_s1, 256 }
  0x5c   : > { %2728 = vmatpush.bf16.msra.mxu3 %v2221_v41  ;;  %1118 = vmatpush.bf16.msra.mxu1 %v2221_v41  ;;  %v403_v41 = vld [vmem:[%s3174_s30 + $0x210] sm:$0xff]  ;;  %v2516_v62 = vld [vmem:[#allocation5 + $0x2e0] sm:$0xf]  ;;  %v2693_v63 = vld [vmem:[#allocation5 + $0x2e4] sm:$0xf0]  ;;  %p2956_p4 = scmp.ne.s32.totalorder %s2954_s1, %s2955_s2  ;;  %p2961_p2 = scmp.lt.s32.totalorder %s2959_s27, %s2955_s2 }
  0x5d   : > { %v3218_v52 = vpack.c.bf16 %v403_v41, %v397_v40  ;;  %v2635_v3 = vld [vmem:[#allocation5 + $0x114] sm:$0xf0]  ;;  %v2348_v7 = vld [vmem:[#allocation5 + $0x190] sm:$0xf]  ;;  %v2420_v10 = vld [vmem:[#allocation5 + $0x220] sm:$0xf] }
  0x5e   : > { %v2651_v9 = vld [vmem:[#allocation5 + $0x194] sm:$0xf0]  ;;  %v2669_v11 = vld [vmem:[#allocation5 + $0x224] sm:$0xf0]  ;;  %v2276_v16 = vld [vmem:[#allocation5 + $0x100] sm:$0xf]  ;;  %p2957_p8 = pnand %p2956_p4, %p3144_p7  ;;  %p2962_p10 = por %p2961_p2, %p2960_p9 }
  0x5f   : > { %1070 = vmatpush.bf16.msra.mxu0 %v2149_v51  ;;  %2721 = vmatpush.bf16.msra.mxu2 %v2149_v51  ;;  %v3216_v51 = vpack.c.bf16 %v355_v39, %v349_v29  ;;  %v2349_v12 = vor.u32 %v2651_v9, %v2348_v7  ;;  %v2421_v13 = vor.u32 %v2669_v11, %v2420_v10  ;;  %v2412_v19 = vld [vmem:[#allocation5 + $0x210] sm:$0xf]  ;;  %v2667_v20 = vld [vmem:[#allocation5 + $0x214] sm:$0xf0]  ;;  %v2500_v21 = vld [vmem:[#allocation5 + $0x2c0] sm:$0xf] }
  0x60   : > { %2729 = vmatpush.bf16.msra.mxu3 %v2213_v55  ;;  %1119 = vmatpush.bf16.msra.mxu1 %v2213_v55  ;;  %v3220_v55 = vpack.c.bf16 %v404_v43, %v398_v42  ;;  %v2340_v23 = vld [vmem:[#allocation5 + $0x180] sm:$0xf]  ;;  %v2649_v25 = vld [vmem:[#allocation5 + $0x184] sm:$0xf0]  ;;  %v2413_v27 = vor.u32 %v2667_v20, %v2412_v19  ;;  %v367_v29 = vld [vmem:[%s3174_s30 + $0xf0] sm:$0xff]  ;;  %p2958_p11 = pneg %p2957_p8 }
  0x61   : > { %v2341_v28 = vor.u32 %v2649_v25, %v2340_v23  ;;  %v2404_v31 = vld [vmem:[#allocation5 + $0x200] sm:$0xf]  ;;  %v2665_v32 = vld [vmem:[#allocation5 + $0x204] sm:$0xf0]  ;;  %v416_v36 = vld [vmem:[%s3174_s30 + $0x278] sm:$0xff] }
  0x62   : > { %1071 = vmatmul.bf16.vlgmr.msra.gmra.mxu0 %v3196_v0  ;;  %1091 = vmatmul.bf16.vlgmr.msra.gmra.mxu2 %v3198_v1  ;;  %v409_v33 = vld [vmem:[%s3174_s30 + $0x240] sm:$0xff]  ;;  %v2492_v37 = vld [vmem:[#allocation5 + $0x2b0] sm:$0xf]  ;;  %v2687_v38 = vld [vmem:[#allocation5 + $0x2b4] sm:$0xf0]  ;;  %v2405_v41 = vor.u32 %v2665_v32, %v2404_v31  ;;  %p2963_p12 = pnand %p2962_p10, %p2958_p11 }
  0x63   : > { %1161 = vmatpush.bf16.msrb.mxu2 %v2333_v58  ;;  %1140 = vmatmul.bf16.vlgmr.msra.gmra.mxu3 %v3200_v4  ;;  %v2357_v58 = vor.u32 %v2653_v54, %v2356_v53  ;;  %v362_v39 = vld [vmem:[%s3174_s30 + $0xc8] sm:$0xff]  ;;  %v368_v40 = vld [vmem:[%s3174_s30 + $0xf8] sm:$0xff]  ;;  %v2614_v49 = vld [vmem:[#allocation5 + $0x74] sm:$0xf] }
  0x64   : > { %1210 = vmatpush.bf16.msrb.mxu3 %v2397_v60  ;;  %1120 = vmatmul.bf16.vlgmr.msra.gmra.mxu1 %v3202_v6  ;;  %v2671_v60 = vld [vmem:[#allocation5 + $0x234] sm:$0xf0]  ;;  %v3242_v46 = vpack.c.bf16 %v368_v40, %v362_v39  ;;  %v2685_v48 = vld [vmem:[#allocation5 + $0x2a4] sm:$0xf0]  ;;  %v2630_v54 = vld [vmem:[#allocation5 + $0xf4] sm:$0xf] }
  0x65   : > { %1259 = vmatpush.bf16.msrb.mxu0 %v2461_v14  ;;  %1308 = vmatpush.bf16.msrb.mxu1 %v2525_v35  ;;  %v2429_v61 = vor.u32 %v2671_v60, %v2428_v59  ;;  %v2508_v14 = vld [vmem:[#allocation5 + $0x2d0] sm:$0xf]  ;;  %v410_v35 = vld [vmem:[%s3174_s30 + $0x248] sm:$0xff]  ;;  %v2683_v60 = vld [vmem:[#allocation5 + $0x294] sm:$0xf0] }
  0x66   : > { %v3240_v44 = vpack.c.bf16 %v416_v36, %v410_v35  ;;  %v2476_v59 = vld [vmem:[#allocation5 + $0x290] sm:$0xf]  ;;  %v421_v7 = vld [vmem:[%s3174_s30 + $0x2a0] sm:$0xff]  ;;  %v422_v10 = vld [vmem:[%s3174_s30 + $0x2a8] sm:$0xff] }
  0x67   : > { %1162 = vmatpush.bf16.msrb.mxu2 %v2325_v5  ;;  %v2517_v5 = vor.u32 %v2693_v63, %v2516_v62  ;;  %v2477_v62 = vor.u32 %v2683_v60, %v2476_v59  ;;  %v2468_v63 = vld [vmem:[#allocation5 + $0x280] sm:$0xf]  ;;  %v428_v11 = vld [vmem:[%s3174_s30 + $0x2d8] sm:$0xff]  ;;  %v2198_v19 = vld [vmem:[#allocation5 + $0x68] sm:$0xf0] }
  0x68   : > { %1211 = vmatpush.bf16.msrb.mxu3 %v2389_v8  ;;  %v2285_v8 = vor.u32 %v2635_v3, %v2284_v2  ;;  %v2681_v2 = vld [vmem:[#allocation5 + $0x284] sm:$0xf0]  ;;  %v373_v3 = vld [vmem:[%s3174_s30 + $0x120] sm:$0xff]  ;;  %v348_v31 = vld [vmem:[%s3174_s30 + $0x58] sm:$0xff] }
  0x69   : > { %1260 = vmatpush.bf16.msrb.mxu0 %v2453_v22  ;;  %1309 = vmatpush.bf16.msrb.mxu1 %v2517_v5  ;;  %v2689_v22 = vld [vmem:[#allocation5 + $0x2c4] sm:$0xf0]  ;;  %v379_v5 = vld [vmem:[%s3174_s30 + $0x150] sm:$0xff]  ;;  %v2469_v9 = vor.u32 %v2681_v2, %v2468_v63  ;;  %v2628_v20 = vld [vmem:[#allocation5 + $0xe4] sm:$0xf] }
  0x6a   : > { %v345_v25 = vld [vmem:[%s3174_s30 + $0x40] sm:$0xff]  ;;  %v2610_v36 = vld [vmem:[#allocation5 + $0x54] sm:$0xf]  ;;  %v2254_v40 = vld [vmem:[#allocation5 + $0xd8] sm:$0xf0] }
  0x6b   : > { %1163 = vmatpush.bf16.msrb.mxu2 %v2317_v15  ;;  %v2691_v15 = vld [vmem:[#allocation5 + $0x2d4] sm:$0xf0]  ;;  %v2182_v63 = vld [vmem:[#allocation5 + $0x48] sm:$0xf0]  ;;  %v2624_v2 = vld [vmem:[#allocation5 + $0xc4] sm:$0xf] }
  0x6c   : > { %1212 = vmatpush.bf16.msrb.mxu3 %v2381_v18  ;;  %v2509_v17 = vor.u32 %v2691_v15, %v2508_v14  ;;  %v2633_v18 = vld [vmem:[#allocation5 + $0x104] sm:$0xf0]  ;;  %v3256_v14 = vpack.c.bf16 %v379_v5, %v373_v3  ;;  %v2246_v5 = vld [vmem:[#allocation5 + $0xc8] sm:$0xf0] }
  0x6d   : > { %1261 = vmatpush.bf16.msrb.mxu0 %v2445_v34  ;;  %v2277_v24 = vor.u32 %v2633_v18, %v2276_v16  ;;  %v415_v34 = vld [vmem:[%s3174_s30 + $0x270] sm:$0xff]  ;;  %v3260_v16 = vpack.c.bf16 %v428_v11, %v422_v10  ;;  %v2612_v18 = vld [vmem:[#allocation5 + $0x64] sm:$0xf] }
  0x6e   : > { %1310 = vmatpush.bf16.msrb.mxu1 %v2509_v17  ;;  %v3238_v43 = vpack.c.bf16 %v415_v34, %v409_v33  ;;  %v365_v10 = vld [vmem:[%s3174_s30 + $0xe0] sm:$0xff]  ;;  %v371_v11 = vld [vmem:[%s3174_s30 + $0x110] sm:$0xff] }
  0x6f   : > { %1164 = vmatpush.bf16.msrb.mxu2 %v2309_v26  ;;  %v361_v26 = vld [vmem:[%s3174_s30 + $0xc0] sm:$0xff]  ;;  %3813 = vst [vmem:[#allocation16_spill] sm:$0xff] %v3260_v16 }
  0x70   : > { %1213 = vmatpush.bf16.msrb.mxu3 %v2373_v30  ;;  %v2501_v30 = vor.u32 %v2689_v22, %v2500_v21  ;;  %v3236_v42 = vpack.c.bf16 %v367_v29, %v361_v26  ;;  %v2201_v21 = vor.u32 %v2612_v18, %v2198_v19  ;;  %v2262_v22 = vld [vmem:[#allocation5 + $0xe8] sm:$0xf0]  ;;  %v341_v26 = vld [vmem:[%s3174_s30 + $0x20] sm:$0xff]  ;;  %v372_v19 = vld [vmem:[%s3174_s30 + $0x118] sm:$0xff] }
  0x71   : > { %1262 = vmatpush.bf16.msrb.mxu0 %v2437_v50  ;;  %v2206_v50 = vld [vmem:[#allocation5 + $0x78] sm:$0xf0]  ;;  %v2265_v23 = vor.u32 %v2628_v20, %v2262_v22  ;;  %v346_v29 = vld [vmem:[%s3174_s30 + $0x48] sm:$0xff] }
  0x72   : > { %1076 = vmatmul.bf16.gmra.mxu0 %v3216_v51  ;;  %1096 = vmatmul.bf16.gmra.mxu2 %v3218_v52  ;;  %v366_v18 = vld [vmem:[%s3174_s30 + $0xe8] sm:$0xff] }
  0x73   : > { %1165 = vmatpush.bf16.msrb.mxu2 %v2301_v45  ;;  %1145 = vmatmul.bf16.gmra.mxu3 %v3220_v55  ;;  %v2493_v45 = vor.u32 %v2687_v38, %v2492_v37  ;;  %v2190_v37 = vld [vmem:[#allocation5 + $0x58] sm:$0xf0]  ;;  %v2626_v38 = vld [vmem:[#allocation5 + $0xd4] sm:$0xf] }
  0x74   : > { %1214 = vmatpush.bf16.msrb.mxu3 %v2365_v47  ;;  %1125 = vmatmul.bf16.gmra.mxu1 %v3222_v56  ;;  %v2484_v47 = vld [vmem:[#allocation5 + $0x2a0] sm:$0xf]  ;;  %v2193_v39 = vor.u32 %v2610_v36, %v2190_v37  ;;  %v383_v37 = vld [vmem:[%s3174_s30 + $0x170] sm:$0xff] }
  0x75   : > { %1263 = vmatpush.bf16.msrb.mxu0 %v2429_v61  ;;  %1311 = vmatpush.bf16.msrb.mxu1 %v2501_v30  ;;  %v2485_v53 = vor.u32 %v2685_v48, %v2484_v47  ;;  %v342_v30 = vld [vmem:[%s3174_s30 + $0x28] sm:$0xff]  ;;  %v357_v47 = vld [vmem:[%s3174_s30 + $0xa0] sm:$0xff] }
  0x76   : > { %v3282_v35 = vpack.c.bf16 %v348_v31, %v342_v30  ;;  %v353_v48 = vld [vmem:[%s3174_s30 + $0x80] sm:$0xff]  ;;  %v375_v30 = vld [vmem:[%s3174_s30 + $0x130] sm:$0xff] }
  0x77   : > { %1166 = vmatpush.bf16.msrb.mxu2 %v2293_v57  ;;  %v2209_v57 = vor.u32 %v2614_v49, %v2206_v50  ;;  %v359_v49 = vld [vmem:[%s3174_s30 + $0xb0] sm:$0xff]  ;;  %v352_v50 = vld [vmem:[%s3174_s30 + $0x78] sm:$0xff]  ;;  %v381_v31 = vld [vmem:[%s3174_s30 + $0x160] sm:$0xff] }
  0x78   : > { %1215 = vmatpush.bf16.msrb.mxu3 %v2357_v58  ;;  %v2270_v58 = vld [vmem:[#allocation5 + $0xf8] sm:$0xf0]  ;;  %3815 = vst [vmem:[#allocation18_spill] sm:$0xff] %v3282_v35  ;;  %v3298_v59 = vpack.c.bf16 %v359_v49, %v353_v48  ;;  %v377_v36 = vld [vmem:[%s3174_s30 + $0x140] sm:$0xff] }
  0x79   : > { %1264 = vmatpush.bf16.msrb.mxu0 %v2421_v13  ;;  %1312 = vmatpush.bf16.msrb.mxu1 %v2493_v45  ;;  %v2273_v61 = vor.u32 %v2630_v54, %v2270_v58  ;;  %v380_v13 = vld [vmem:[%s3174_s30 + $0x158] sm:$0xff]  ;;  %v351_v45 = vld [vmem:[%s3174_s30 + $0x70] sm:$0xff]  ;;  %v354_v54 = vld [vmem:[%s3174_s30 + $0x88] sm:$0xff] }
  0x7a   : > { %v3296_v58 = vpack.c.bf16 %v357_v47, %v351_v45  ;;  %3816 = vst [vmem:[#allocation19_spill] sm:$0xff] %v3298_v59  ;;  %v3336_v45 = vpack.c.bf16 %v381_v31, %v375_v30  ;;  %v3338_v47 = vpack.c.bf16 %v383_v37, %v377_v36  ;;  %v2602_v30 = vld [vmem:[#allocation5 + $0x14] sm:$0xf]  ;;  %v2158_v31 = vld [vmem:[#allocation5 + $0x18] sm:$0xf0] }
  0x7b   : > { %1167 = vmatpush.bf16.msrb.mxu2 %v2285_v8  ;;  %v427_v8 = vld [vmem:[%s3174_s30 + $0x2d0] sm:$0xff] }
  0x7c   : > { %1216 = vmatpush.bf16.msrb.mxu3 %v2349_v12  ;;  %v374_v12 = vld [vmem:[%s3174_s30 + $0x128] sm:$0xff]  ;;  %v3258_v15 = vpack.c.bf16 %v427_v8, %v421_v7  ;;  %v2249_v7 = vor.u32 %v2624_v2, %v2246_v5  ;;  %v363_v8 = vld [vmem:[%s3174_s30 + $0xd0] sm:$0xff]  ;;  %3820 = vst [vmem:[#allocation23_spill] sm:$0xff] %v3338_v47  ;;  %v389_v5 = vld [vmem:[%s3174_s30 + $0x1a0] sm:$0xff] }
  0x7d   : > { %1265 = vmatpush.bf16.msrb.mxu0 %v2413_v27  ;;  %1313 = vmatpush.bf16.msrb.mxu1 %v2485_v53  ;;  %v3262_v17 = vpack.c.bf16 %v380_v13, %v374_v12  ;;  %v347_v27 = vld [vmem:[%s3174_s30 + $0x50] sm:$0xff]  ;;  %v358_v53 = vld [vmem:[%s3174_s30 + $0xa8] sm:$0xff]  ;;  %v364_v12 = vld [vmem:[%s3174_s30 + $0xd8] sm:$0xff] }
  0x7e   : > { %3812 = vst [vmem:[#allocation15_spill] sm:$0xff] %v3258_v15  ;;  %v3278_v33 = vpack.c.bf16 %v347_v27, %v341_v26  ;;  %v3300_v60 = vpack.c.bf16 %v358_v53, %v352_v50  ;;  %v370_v13 = vld [vmem:[%s3174_s30 + $0x108] sm:$0xff]  ;;  %v2622_v26 = vld [vmem:[#allocation5 + $0xb4] sm:$0xf]  ;;  %v2604_v50 = vld [vmem:[#allocation5 + $0x24] sm:$0xf] }
  0x7f   : > { %1168 = vmatpush.bf16.msrb.mxu2 %v2277_v24  ;;  %v339_v24 = vld [vmem:[%s3174_s30 + $0x10] sm:$0xff]  ;;  %v3320_v22 = vpack.c.bf16 %v370_v13, %v364_v12  ;;  %v2166_v53 = vld [vmem:[#allocation5 + $0x28] sm:$0xf0] }
  0x80   : > { %1217 = vmatpush.bf16.msrb.mxu3 %v2341_v28  ;;  %v340_v28 = vld [vmem:[%s3174_s30 + $0x18] sm:$0xff]  ;;  %v3276_v32 = vpack.c.bf16 %v345_v25, %v339_v24  ;;  %3814 = vst [vmem:[#allocation17_spill] sm:$0xff] %v3278_v33  ;;  %v2606_v24 = vld [vmem:[#allocation5 + $0x34] sm:$0xf] }
  0x81   : > { %1266 = vmatpush.bf16.msrb.mxu0 %v2405_v41  ;;  %1314 = vmatpush.bf16.msrb.mxu1 %v2477_v62  ;;  %v3280_v34 = vpack.c.bf16 %v346_v29, %v340_v28  ;;  %v2257_v41 = vor.u32 %v2626_v38, %v2254_v40  ;;  %v2608_v62 = vld [vmem:[#allocation5 + $0x44] sm:$0xf]  ;;  %v2174_v25 = vld [vmem:[#allocation5 + $0x38] sm:$0xf0]  ;;  %v378_v40 = vld [vmem:[%s3174_s30 + $0x148] sm:$0xff] }
  0x82   : > { %1081 = vmatmul.bf16.gmra.mxu0 %v3236_v42  ;;  %1101 = vmatmul.bf16.gmra.mxu2 %v3238_v43  ;;  %v2185_v3 = vor.u32 %v2608_v62, %v2182_v63  ;;  %v2177_v27 = vor.u32 %v2606_v24, %v2174_v25  ;;  %v2238_v28 = vld [vmem:[#allocation5 + $0xb8] sm:$0xf0]  ;;  %v2230_v62 = vld [vmem:[#allocation5 + $0xa8] sm:$0xf0]  ;;  %v387_v2 = vld [vmem:[%s3174_s30 + $0x190] sm:$0xff] }
  0x83   : > { %1150 = vmatmul.bf16.gmra.mxu3 %v3240_v44  ;;  %1357 = vmatpush.bf16.msra.mxu2 %v2209_v57  ;;  %v360_v57 = vld [vmem:[%s3174_s30 + $0xb8] sm:$0xff]  ;;  %v2241_v29 = vor.u32 %v2622_v26, %v2238_v28  ;;  %v2646_v28 = vld [vmem:[#allocation5 + $0x174] sm:$0xf] }
  0x84   : > { %1130 = vmatmul.bf16.gmra.mxu1 %v3242_v46  ;;  %1406 = vmatpush.bf16.msra.mxu3 %v2273_v61  ;;  %v3302_v61 = vpack.c.bf16 %v360_v57, %v354_v54  ;;  %v376_v38 = vld [vmem:[%s3174_s30 + $0x138] sm:$0xff]  ;;  %v2620_v54 = vld [vmem:[#allocation5 + $0xa4] sm:$0xf]  ;;  %v2169_v57 = vor.u32 %v2604_v50, %v2166_v53  ;;  %v2618_v37 = vld [vmem:[#allocation5 + $0x94] sm:$0xf] }
  0x85   : > { %1315 = vmatpush.bf16.msrb.mxu1 %v2469_v9  ;;  %v369_v9 = vld [vmem:[%s3174_s30 + $0x100] sm:$0xff]  ;;  %v2233_v63 = vor.u32 %v2620_v54, %v2230_v62  ;;  %v2326_v53 = vld [vmem:[#allocation5 + $0x168] sm:$0xf0] }
  0x86   : > { %3817 = vst [vmem:[#allocation20_spill] sm:$0xff] %v3302_v61  ;;  %v3316_v20 = vpack.c.bf16 %v369_v9, %v363_v8  ;;  %v388_v8 = vld [vmem:[%s3174_s30 + $0x198] sm:$0xff]  ;;  %v394_v9 = vld [vmem:[%s3174_s30 + $0x1c8] sm:$0xff]  ;;  %v2644_v50 = vld [vmem:[#allocation5 + $0x164] sm:$0xf] }
  0x87   : > { %1358 = vmatpush.bf16.msra.mxu2 %v2201_v21  ;;  %v3318_v21 = vpack.c.bf16 %v371_v11, %v365_v10  ;;  %v390_v10 = vld [vmem:[%s3174_s30 + $0x1a8] sm:$0xff]  ;;  %v396_v11 = vld [vmem:[%s3174_s30 + $0x1d8] sm:$0xff]  ;;  %v3364_v24 = vpack.c.bf16 %v394_v9, %v388_v8  ;;  %v2329_v62 = vor.u32 %v2644_v50, %v2326_v53  ;;  %v399_v9 = vld [vmem:[%s3174_s30 + $0x1f0] sm:$0xff] }
  0x88   : > { %1407 = vmatpush.bf16.msra.mxu3 %v2265_v23  ;;  %v3322_v23 = vpack.c.bf16 %v372_v19, %v366_v18  ;;  %v3360_v18 = vld [vmem:[#allocation7] sm:$0x3]  ;;  %v3366_v25 = vpack.c.bf16 %v396_v11, %v390_v10  ;;  %v400_v11 = vld [vmem:[%s3174_s30 + $0x1f8] sm:$0xff] }
  0x89   : > { %3818 = vst [vmem:[#allocation21_spill] sm:$0xff] %v3318_v21  ;;  %v405_v10 = vld [vmem:[%s3174_s30 + $0x220] sm:$0xff] }
  0x8a   : > { %3819 = vst [vmem:[#allocation22_spill] sm:$0xff] %v3322_v23  ;;  %v3393_v53 = vpack.c.bf16 %v405_v10, %v399_v9  ;;  %v2638_v9 = vld [vmem:[#allocation5 + $0x134] sm:$0xf]  ;;  %v2302_v10 = vld [vmem:[#allocation5 + $0x138] sm:$0xf0] }
  0x8b   : > { %1359 = vmatpush.bf16.msra.mxu2 %v2193_v39  ;;  %v382_v39 = vld [vmem:[%s3174_s30 + $0x168] sm:$0xff]  ;;  %3823 = vst [vmem:[#allocation26_spill] sm:$0xff] %v3360_v18 }
  0x8c   : > { %1408 = vmatpush.bf16.msra.mxu3 %v2257_v41  ;;  %v384_v41 = vld [vmem:[%s3174_s30 + $0x178] sm:$0xff]  ;;  %v3340_v48 = vpack.c.bf16 %v382_v39, %v376_v38  ;;  %3824 = vst [vmem:[#allocation27_spill] sm:$0xff] %v3366_v25  ;;  %v2161_v38 = vor.u32 %v2602_v30, %v2158_v31  ;;  %v406_v30 = vld [vmem:[%s3174_s30 + $0x228] sm:$0xff] }
  0x8d   : > { %v3342_v49 = vpack.c.bf16 %v384_v41, %v378_v40  ;;  %v2222_v39 = vld [vmem:[#allocation5 + $0x98] sm:$0xf0]  ;;  %v402_v31 = vld [vmem:[%s3174_s30 + $0x208] sm:$0xff] }
  0x8e   : > { %v2225_v41 = vor.u32 %v2618_v37, %v2222_v39  ;;  %v2310_v39 = vld [vmem:[#allocation5 + $0x148] sm:$0xf0] }
  0x8f   : > { %1360 = vmatpush.bf16.msra.mxu2 %v2185_v3  ;;  %3821 = vst [vmem:[#allocation24_spill] sm:$0xff] %v3342_v49  ;;  %v393_v3 = vld [vmem:[%s3174_s30 + $0x1c0] sm:$0xff] }
  0x90   : > { %1409 = vmatpush.bf16.msra.mxu3 %v2249_v7  ;;  %v395_v7 = vld [vmem:[%s3174_s30 + $0x1d0] sm:$0xff]  ;;  %v3356_v12 = vpack.c.bf16 %v393_v3, %v387_v2 }
  0x91   : > { %v3358_v13 = vpack.c.bf16 %v395_v7, %v389_v5  ;;  %v2642_v3 = vld [vmem:[#allocation5 + $0x154] sm:$0xf]  ;;  %v2318_v5 = vld [vmem:[#allocation5 + $0x158] sm:$0xf0] }
  0x92   : > { %1086 = vmatmul.bf16.gmra.mxu0 %v3256_v14  ;;  %1106 = vmatmul.bf16.gmra.mxu2 %v3258_v15  ;;  %v2321_v8 = vor.u32 %v2642_v3, %v2318_v5  ;;  %v3399_v5 = vpack.c.bf16 %v406_v30, %v400_v11  ;;  %v2600_v11 = vld [vmem:[#allocation5 + $0x4] sm:$0xf]  ;;  %v2305_v30 = vor.u32 %v2638_v9, %v2302_v10  ;;  %v2382_v10 = vld [vmem:[#allocation5 + $0x1d8] sm:$0xf0] }
  0x93   : > { %1155 = vmatmul.bf16.gmra.mxu3 %v3260_v16  ;;  %1361 = vmatpush.bf16.msra.mxu2 %v2177_v27  ;;  %3822 = vst [vmem:[#allocation25_spill] sm:$0xff] %v3358_v13  ;;  %v3371_v27 = vperm.slane %v3360_v18, 0  ;;  %v432_v15 = vld [vmem:[%s3174_s30 + $0x2f8] sm:$0xff] }
  0x94   : > { %1135 = vmatmul.bf16.gmra.mxu1 %v3262_v17  ;;  %1410 = vmatpush.bf16.msra.mxu3 %v2241_v29  ;;  %v2334_v29 = vld [vmem:[#allocation5 + $0x178] sm:$0xf0] }
  0x95   : > { %v2337_v36 = vor.u32 %v2646_v28, %v2334_v29  ;;  %v401_v28 = vld [vmem:[%s3174_s30 + $0x200] sm:$0xff]  ;;  %v407_v29 = vld [vmem:[%s3174_s30 + $0x230] sm:$0xff] }
  0x97   : > { %1362 = vmatpush.bf16.msra.mxu2 %v2169_v57  ;;  %1455 = vmatpush.bf16.msra.mxu0 %v2337_v36  ;;  %v408_v36 = vld [vmem:[%s3174_s30 + $0x238] sm:$0xff] }
  0x98   : > { %1411 = vmatpush.bf16.msra.mxu3 %v2233_v63 }
  0x9b   : > { %1363 = vmatpush.bf16.msra.mxu2 %v2161_v38  ;;  %1456 = vmatpush.bf16.msra.mxu0 %v2329_v62  ;;  %v2640_v38 = vld [vmem:[#allocation5 + $0x144] sm:$0xf]  ;;  %v2398_v62 = vld [vmem:[#allocation5 + $0x1f8] sm:$0xf0] }
  0x9c   : > { %1412 = vmatpush.bf16.msra.mxu3 %v2225_v41 }
  0x9f   : > { %1457 = vmatpush.bf16.msra.mxu0 %v2321_v8  ;;  %v3403_v8 = vpack.c.bf16 %v408_v36, %v402_v31 }
  0xa1   : > { %3826 = vst [vmem:[#allocation29_spill] sm:$0xff] %v3403_v8 }
  0xa2   : > { %1169 = vmatmul.bf16.vlgmr.msrb.gmra.mxu2 %v3276_v32  ;;  %1267 = vmatmul.bf16.vlgmr.msrb.gmra.mxu0 %v3278_v33 }
  0xa3   : > { %1218 = vmatmul.bf16.vlgmr.msrb.gmra.mxu3 %v3280_v34 }
  0xa4   : > { %1316 = vmatmul.bf16.vlgmr.msrb.gmra.mxu1 %v3282_v35 }
  0xb2   : > { %1174 = vmatmul.bf16.gmra.mxu2 %v3296_v58  ;;  %1272 = vmatmul.bf16.gmra.mxu0 %v3298_v59 }
  0xb3   : > { %1223 = vmatmul.bf16.gmra.mxu3 %v3300_v60 }
  0xb4   : > { %1321 = vmatmul.bf16.gmra.mxu1 %v3302_v61  ;;  %v2654_v61 = vld [vmem:[#allocation5 + $0x1b4] sm:$0xf] }
  0xc2   : > { %1179 = vmatmul.bf16.gmra.mxu2 %v3316_v20  ;;  %1277 = vmatmul.bf16.gmra.mxu0 %v3318_v21  ;;  %v2278_v21 = vld [vmem:[#allocation5 + $0x108] sm:$0xf0] }
  0xc3   : > { %1228 = vmatmul.bf16.gmra.mxu3 %v3320_v22 }
  0xc4   : > { %1326 = vmatmul.bf16.gmra.mxu1 %v3322_v23  ;;  %v2632_v23 = vld [vmem:[#allocation5 + $0x104] sm:$0xf] }
  0xd2   : > { %1184 = vmatmul.bf16.gmra.mxu2 %v3336_v45  ;;  %1282 = vmatmul.bf16.gmra.mxu0 %v3338_v47 }
  0xd3   : > { %1233 = vmatmul.bf16.gmra.mxu3 %v3340_v48 }
  0xd4   : > { %1331 = vmatmul.bf16.gmra.mxu1 %v3342_v49 }
  0xdf   : > { %v3362_v19 = vpop.f32.mrf.mxu0 }
  0xe1   : > { %v3368_v26 = vpop.f32.mrf.mxu1 }
  0xe2   : > { %1189 = vmatmul.bf16.gmra.mxu2 %v3356_v12  ;;  %1287 = vmatmul.bf16.gmra.mxu0 %v3358_v13 }
  0xe3   : > { %1238 = vmatmul.bf16.gmra.mxu3 %v3364_v24 }
  0xe4   : > { %1336 = vmatmul.bf16.gmra.mxu1 %v3366_v25 }
  0xe5   : > { %v1092_v40 = vpop.f32.mrf.mxu2 }
  0xe6   : > { %v1093_v54 = vadd.f32 %v1092_v40, %v3371_v27  ;;  %v1141_v57 = vpop.f32.mrf.mxu3  ;;  %v2662_v40 = vld [vmem:[#allocation5 + $0x1f4] sm:$0xf] }
  0xe7   : > { %v3378_v63 = vpop.f32.mrf.mxu0  ;;  %v2401_v25 = vor.u32 %v2662_v40, %v2398_v62 }
  0xe8   : > { %v3380_v2 = vadd.f32 %v1141_v57, %v1093_v54  ;;  %v3395_v54 = vpack.c.bf16 %v407_v29, %v401_v28  ;;  %v2313_v57 = vor.u32 %v2640_v38, %v2310_v39  ;;  %v2660_v28 = vld [vmem:[#allocation5 + $0x1e4] sm:$0xf]  ;;  %v2150_v29 = vld [vmem:[#allocation5 + $0x8] sm:$0xf0] }
  0xe9   : > { %v3382_v7 = vpop.f32.mrf.mxu1  ;;  %1504 = vmatpush.bf16.msra.mxu1 %v2401_v25  ;;  %v2153_v31 = vor.u32 %v2600_v11, %v2150_v29  ;;  %v2616_v38 = vld [vmem:[#allocation5 + $0x84] sm:$0xf]  ;;  %v2214_v39 = vld [vmem:[#allocation5 + $0x88] sm:$0xf0] }
  0xea   : > { %3825 = vst [vmem:[#allocation28_spill] sm:$0xff] %v3395_v54  ;;  %1458 = vmatpush.bf16.msra.mxu0 %v2313_v57  ;;  %v2217_v40 = vor.u32 %v2616_v38, %v2214_v39  ;;  %v2658_v57 = vld [vmem:[#allocation5 + $0x1d4] sm:$0xf]  ;;  %v2656_v38 = vld [vmem:[#allocation5 + $0x1c4] sm:$0xf] }
  0xeb   : > { %1364 = vmatpush.bf16.msra.mxu2 %v2153_v31  ;;  %v2374_v39 = vld [vmem:[#allocation5 + $0x1c8] sm:$0xf0] }
  0xec   : > { %1413 = vmatpush.bf16.msra.mxu3 %v2217_v40  ;;  %v412_v40 = vld [vmem:[%s3174_s30 + $0x258] sm:$0xff] }
  0xed   : > { %v1094_v37 = vpop.f32.mrf.mxu2 }
  0xee   : > { %v1095_v41 = vadd.f32 %v1094_v37, %v3371_v27  ;;  %v1143_v50 = vpop.f32.mrf.mxu3  ;;  %v2390_v37 = vld [vmem:[#allocation5 + $0x1e8] sm:$0xf0]  ;;  %1459 = vmatpush.bf16.msra.mxu0 %v2305_v30  ;;  %v2634_v30 = vld [vmem:[#allocation5 + $0x114] sm:$0xf] }
  0xef   : > { %v3397_v3 = vpop.f32.mrf.mxu0  ;;  %v2393_v36 = vor.u32 %v2660_v28, %v2390_v37  ;;  %v2385_v28 = vor.u32 %v2658_v57, %v2382_v10  ;;  %v2286_v37 = vld [vmem:[#allocation5 + $0x118] sm:$0xf0]  ;;  %v419_v57 = vld [vmem:[%s3174_s30 + $0x290] sm:$0xff]  ;;  %v418_v10 = vld [vmem:[%s3174_s30 + $0x288] sm:$0xff] }
  0xf0   : > { %v3401_v13 = vadd.f32 %v1143_v50, %v1095_v41  ;;  %v2636_v41 = vld [vmem:[#allocation5 + $0x124] sm:$0xf]  ;;  %v2294_v50 = vld [vmem:[#allocation5 + $0x128] sm:$0xf0]  ;;  %v3433_v35 = vpack.c.bf16 %v418_v10, %v412_v40  ;;  %v2350_v10 = vld [vmem:[#allocation5 + $0x198] sm:$0xf0] }
  0xf1   : > { %v3405_v49 = vpop.f32.mrf.mxu1  ;;  %1505 = vmatpush.bf16.msra.mxu1 %v2393_v36  ;;  %v2297_v9 = vor.u32 %v2636_v41, %v2294_v50  ;;  %v2289_v36 = vor.u32 %v2634_v30, %v2286_v37  ;;  %v417_v41 = vld [vmem:[%s3174_s30 + $0x280] sm:$0xff]  ;;  %v2377_v50 = vor.u32 %v2656_v38, %v2374_v39  ;;  %v2366_v38 = vld [vmem:[#allocation5 + $0x1b8] sm:$0xf0] }
  0xf2   : > { %1194 = vmatmul.bf16.gmra.mxu2 %v3393_v53  ;;  %1292 = vmatmul.bf16.gmra.mxu0 %v3395_v54  ;;  %3828 = vst [vmem:[#allocation31_spill] sm:$0xff] %v3433_v35  ;;  %v2369_v18 = vor.u32 %v2654_v61, %v2366_v38  ;;  %v2694_v61 = vld [vmem:[#allocation5 + $0x2f4] sm:$0xf] }
  0xf3   : > { %1243 = vmatmul.bf16.gmra.mxu3 %v3399_v5  ;;  %1460 = vmatpush.bf16.msra.mxu0 %v2297_v9 }
  0xf4   : > { %1341 = vmatmul.bf16.gmra.mxu1 %v3403_v8  ;;  %v413_v8 = vld [vmem:[%s3174_s30 + $0x260] sm:$0xff] }
  0xf5   : > { %v1097_v25 = vpop.f32.mrf.mxu2  ;;  %1506 = vmatpush.bf16.msra.mxu1 %v2385_v28  ;;  %v3429_v37 = vpack.c.bf16 %v419_v57, %v413_v8  ;;  %v2281_v28 = vor.u32 %v2632_v23, %v2278_v21  ;;  %v2678_v21 = vld [vmem:[#allocation5 + $0x274] sm:$0xf]  ;;  %v2462_v23 = vld [vmem:[#allocation5 + $0x278] sm:$0xf0] }
  0xf6   : > { %v1098_v62 = vadd.f32 %v1097_v25, %v3371_v27  ;;  %v1146_v54 = vpop.f32.mrf.mxu3  ;;  %v411_v25 = vld [vmem:[%s3174_s30 + $0x250] sm:$0xff] }
  0xf7   : > { %v3412_v11 = vpop.f32.mrf.mxu0  ;;  %1461 = vmatpush.bf16.msra.mxu0 %v2289_v36  ;;  %v3427_v30 = vpack.c.bf16 %v417_v41, %v411_v25  ;;  %3827 = vst [vmem:[#allocation30_spill] sm:$0xff] %v3429_v37  ;;  %v2358_v25 = vld [vmem:[#allocation5 + $0x1a8] sm:$0xf0]  ;;  %v2526_v41 = vld [vmem:[#allocation5 + $0x2f8] sm:$0xf0] }
  0xf8   : > { %v3414_v29 = vadd.f32 %v1146_v54, %v1098_v62  ;;  %v414_v54 = vld [vmem:[%s3174_s30 + $0x268] sm:$0xff]  ;;  %v420_v62 = vld [vmem:[%s3174_s30 + $0x298] sm:$0xff]  ;;  %v2529_v40 = vor.u32 %v2694_v61, %v2526_v41  ;;  %v2650_v57 = vld [vmem:[#allocation5 + $0x194] sm:$0xf] }
  0xf9   : > { %v3416_v31 = vpop.f32.mrf.mxu1  ;;  %1507 = vmatpush.bf16.msra.mxu1 %v2377_v50  ;;  %v3437_v36 = vpack.c.bf16 %v420_v62, %v414_v54  ;;  %v425_v61 = vld [vmem:[%s3174_s30 + $0x2c0] sm:$0xff]  ;;  %v431_v41 = vld [vmem:[%s3174_s30 + $0x2f0] sm:$0xff] }
  0xfa   : > { %1602 = vmatpush.bf16.msrb.mxu3 %v2529_v40 }
  0xfb   : > { %3829 = vst [vmem:[#allocation32_spill] sm:$0xff] %v3437_v36  ;;  %1462 = vmatpush.bf16.msra.mxu0 %v2281_v28 }
  0xfd   : > { %v1099_v47 = vpop.f32.mrf.mxu2  ;;  %1508 = vmatpush.bf16.msra.mxu1 %v2369_v18 }
  0xfe   : > { %v1100_v59 = vadd.f32 %v1099_v47, %v3371_v27  ;;  %v1148_v9 = vpop.f32.mrf.mxu3  ;;  %v2652_v47 = vld [vmem:[#allocation5 + $0x1a4] sm:$0xf] }
  0xff   : > { %v3431_v39 = vpop.f32.mrf.mxu0  ;;  %v2361_v8 = vor.u32 %v2652_v47, %v2358_v25  ;;  %v2648_v47 = vld [vmem:[#allocation5 + $0x184] sm:$0xf]  ;;  %v2342_v25 = vld [vmem:[#allocation5 + $0x188] sm:$0xf0] }
 0x100   : > { %v3435_v33 = vadd.f32 %v1148_v9, %v1100_v59  ;;  %v2465_v59 = vor.u32 %v2678_v21, %v2462_v23  ;;  %v2353_v9 = vor.u32 %v2650_v57, %v2350_v10  ;;  %v423_v21 = vld [vmem:[%s3174_s30 + $0x2b0] sm:$0xff]  ;;  %v429_v23 = vld [vmem:[%s3174_s30 + $0x2e0] sm:$0xff] }
 0x101   : > { %v3439_v16 = vpop.f32.mrf.mxu1  ;;  %1509 = vmatpush.bf16.msra.mxu1 %v2361_v8  ;;  %v426_v8 = vld [vmem:[%s3174_s30 + $0x2c8] sm:$0xff]  ;;  %v3461_v10 = vpack.c.bf16 %v429_v23, %v423_v21 }
 0x102   : > { %1199 = vmatmul.bf16.gmra.mxu2 %v3427_v30  ;;  %1297 = vmatmul.bf16.gmra.mxu0 %v3429_v37 }
 0x103   : > { %1248 = vmatmul.bf16.gmra.mxu3 %v3433_v35  ;;  %1553 = vmatpush.bf16.msrb.mxu2 %v2465_v59  ;;  %v2345_v59 = vor.u32 %v2648_v47, %v2342_v25  ;;  %v2454_v25 = vld [vmem:[#allocation5 + $0x268] sm:$0xf0] }
 0x104   : > { %1346 = vmatmul.bf16.gmra.mxu1 %v3437_v36  ;;  %v430_v36 = vld [vmem:[%s3174_s30 + $0x2e8] sm:$0xff] }
 0x105   : > { %v1102_v50 = vpop.f32.mrf.mxu2  ;;  %1510 = vmatpush.bf16.msra.mxu1 %v2353_v9  ;;  %v3471_v9 = vpack.c.bf16 %v432_v15, %v426_v8 }
 0x106   : > { %v1103_v54 = vadd.f32 %v1102_v50, %v3371_v27  ;;  %v1151_v62 = vpop.f32.mrf.mxu3  ;;  %v424_v50 = vld [vmem:[%s3174_s30 + $0x2b8] sm:$0xff] }
 0x107   : > { %v3446_v18 = vpop.f32.mrf.mxu0  ;;  %3832 = vst [vmem:[#allocation35_spill] sm:$0xff] %v3471_v9 }
 0x108   : > { %v3448_v28 = vadd.f32 %v1151_v62, %v1103_v54  ;;  %v3463_v54 = vpack.c.bf16 %v431_v41, %v425_v61 }
 0x109   : > { %v3450_v38 = vpop.f32.mrf.mxu1  ;;  %1511 = vmatpush.bf16.msra.mxu1 %v2345_v59  ;;  %v2692_v59 = vld [vmem:[#allocation5 + $0x2e4] sm:$0xf] }
 0x10a   : > { %3830 = vst [vmem:[#allocation33_spill] sm:$0xff] %v3448_v28  ;;  %v3467_v28 = vpack.c.bf16 %v430_v36, %v424_v50  ;;  %v2518_v50 = vld [vmem:[#allocation5 + $0x2e8] sm:$0xf0] }
 0x10b   : > { %3831 = vst [vmem:[#allocation34_spill] sm:$0xff] %v3463_v54 }
 0x10d   : > { %v1104_v37 = vpop.f32.mrf.mxu2 }
 0x10e   : > { %v1105_v40 = vadd.f32 %v1104_v37, %v3371_v27  ;;  %v1153_v57 = vpop.f32.mrf.mxu3  ;;  %v2676_v37 = vld [vmem:[#allocation5 + $0x264] sm:$0xf] }
 0x10f   : > { %v3465_v62 = vpop.f32.mrf.mxu0  ;;  %v2457_v21 = vor.u32 %v2676_v37, %v2454_v25 }
 0x110   : > { %v3469_v35 = vadd.f32 %v1153_v57, %v1105_v40  ;;  %v2521_v40 = vor.u32 %v2692_v59, %v2518_v50  ;;  %v2446_v59 = vld [vmem:[#allocation5 + $0x258] sm:$0xf0] }
 0x111   : > { %v3473_v47 = vpop.f32.mrf.mxu1  ;;  %1554 = vmatpush.bf16.msrb.mxu2 %v2457_v21 }
 0x112   : > { %1204 = vmatmul.bf16.gmra.mxu2 %v3461_v10  ;;  %1302 = vmatmul.bf16.gmra.mxu0 %v3463_v54 }
 0x113   : > { %1253 = vmatmul.bf16.gmra.mxu3 %v3467_v28 }
 0x114   : > { %1351 = vmatmul.bf16.gmra.mxu1 %v3471_v9  ;;  %1603 = vmatpush.bf16.msrb.mxu3 %v2521_v40  ;;  %v1073_v9 = vadd.f32 %v3362_v19, %v3371_v27  ;;  %v1075_v40 = vadd.f32 %v3378_v63, %v3371_v27 }
 0x115   : > { %v1107_v36 = vpop.f32.mrf.mxu2 }
 0x116   : > { %v1108_v23 = vadd.f32 %v1107_v36, %v3371_v27  ;;  %v1156_v61 = vpop.f32.mrf.mxu3 }
 0x117   : > { %v3480_v15 = vpop.f32.mrf.mxu0 }
 0x118   : > { %v3482_v41 = vadd.f32 %v1156_v61, %v1108_v23  ;;  %v1122_v23 = vadd.f32 %v3368_v26, %v1073_v9  ;;  %v2674_v61 = vld [vmem:[#allocation5 + $0x254] sm:$0xf] }
 0x119   : > { %v3484_v8 = vpop.f32.mrf.mxu1  ;;  %v2449_v19 = vor.u32 %v2674_v61, %v2446_v59  ;;  %v1078_v59 = vadd.f32 %v3397_v3, %v3371_v27  ;;  %v2672_v3 = vld [vmem:[#allocation5 + $0x244] sm:$0xf] }
 0x11a   : > { %3833 = vst [vmem:[#allocation36_spill] sm:$0xff] %v3482_v41 }
 0x11b   : > { %1555 = vmatpush.bf16.msrb.mxu2 %v2449_v19 }
 0x11d   : > { %v1109_v57 = vpop.f32.mrf.mxu2 }
 0x11e   : > { %v1110_v37 = vadd.f32 %v1109_v57, %v3371_v27  ;;  %v1158_v25 = vpop.f32.mrf.mxu3 }
 0x11f   : > { %v1268_v36 = vpop.f32.mrf.mxu0 }
 0x120   : > { %v3489_v54 = vadd.f32 %v1158_v25, %v1110_v37  ;;  %v2510_v25 = vld [vmem:[#allocation5 + $0x2d8] sm:$0xf0] }
 0x121   : > { %v1317_v21 = vpop.f32.mrf.mxu1 }
 0x122   : > { %3834 = vst [vmem:[#allocation37_spill] sm:$0xff] %v3489_v54  ;;  %1365 = vmatmul.bf16.vlgmr.msra.gmra.mxu2 %v3196_v0  ;;  %1463 = vmatmul.bf16.vlgmr.msra.gmra.mxu0 %v3276_v32  ;;  %v2690_v0 = vld [vmem:[#allocation5 + $0x2d4] sm:$0xf] }
 0x123   : > { %1414 = vmatmul.bf16.vlgmr.msra.gmra.mxu3 %v3202_v6  ;;  %v2513_v54 = vor.u32 %v2690_v0, %v2510_v25  ;;  %v1124_v6 = vadd.f32 %v3382_v7, %v1075_v40  ;;  %v1127_v7 = vadd.f32 %v3405_v49, %v1078_v59 }
 0x124   : > { %1512 = vmatmul.bf16.vlgmr.msra.gmra.mxu1 %v3280_v34 }
 0x125   : > { %v1170_v50 = vpop.f32.mrf.mxu2  ;;  %1604 = vmatpush.bf16.msrb.mxu3 %v2513_v54 }
 0x126   : > { %v1171_v57 = vadd.f32 %v1170_v50, %v1122_v23  ;;  %v1219_v37 = vpop.f32.mrf.mxu3 }
 0x127   : > { %v1270_v26 = vpop.f32.mrf.mxu0 }
 0x128   : > { %v1220_v9 = vadd.f32 %v1219_v37, %v1171_v57 }
 0x129   : > { %v1319_v32 = vpop.f32.mrf.mxu1 }
 0x12a   : > { %v1269_v41 = vadd.f32 %v1268_v36, %v1220_v9  ;;  %v1080_v9 = vadd.f32 %v3412_v11, %v3371_v27 }
 0x12c   : > { %v1318_v34 = vadd.f32 %v1317_v21, %v1269_v41  ;;  %v2438_v41 = vld [vmem:[#allocation5 + $0x248] sm:$0xf0] }
 0x12d   : > { %v1172_v61 = vpop.f32.mrf.mxu2  ;;  %v2441_v21 = vor.u32 %v2672_v3, %v2438_v41 }
 0x12e   : > { %v1651_v63 = vmax.f32 %v1318_v34, 0.0  ;;  %v1173_v23 = vadd.f32 %v1172_v61, %v1124_v6  ;;  %v1221_v50 = vpop.f32.mrf.mxu3  ;;  %v2502_v6 = vld [vmem:[#allocation5 + $0x2c8] sm:$0xf0] }
 0x12f   : > { %v1273_v19 = vpop.f32.mrf.mxu0  ;;  %1556 = vmatpush.bf16.msrb.mxu2 %v2441_v21 }
 0x130   : > { %1683 = vst [vmem:[%s3502_s8] sm:$0xff] %v1651_v63  ;;  %v1222_v57 = vadd.f32 %v1221_v50, %v1173_v23  ;;  %v1083_v23 = vadd.f32 %v3431_v39, %v3371_v27 }
 0x131   : > { %v1322_v37 = vpop.f32.mrf.mxu1 }
 0x132   : > { %1370 = vmatmul.bf16.gmra.mxu2 %v3216_v51  ;;  %1468 = vmatmul.bf16.gmra.mxu0 %v3296_v58  ;;  %v1271_v54 = vadd.f32 %v1270_v26, %v1222_v57  ;;  %v2688_v26 = vld [vmem:[#allocation5 + $0x2c4] sm:$0xf]  ;;  %v1132_v41 = vadd.f32 %v3439_v16, %v1083_v23 }
 0x133   : > { %1419 = vmatmul.bf16.gmra.mxu3 %v3222_v56  ;;  %v2505_v34 = vor.u32 %v2688_v26, %v2502_v6 }
 0x134   : > { %v1320_v36 = vadd.f32 %v1319_v32, %v1271_v54  ;;  %1517 = vmatmul.bf16.gmra.mxu1 %v3300_v60  ;;  %v1129_v60 = vadd.f32 %v3416_v31, %v1080_v9 }
 0x135   : > { %v1175_v40 = vpop.f32.mrf.mxu2  ;;  %1605 = vmatpush.bf16.msrb.mxu3 %v2505_v34 }
 0x136   : > { %v1653_v0 = vmax.f32 %v1320_v36, 0.0  ;;  %v1176_v49 = vadd.f32 %v1175_v40, %v1127_v7  ;;  %v1224_v25 = vpop.f32.mrf.mxu3  ;;  %v1085_v40 = vadd.f32 %v3446_v18, %v3371_v27 }
 0x137   : > { %v1275_v51 = vpop.f32.mrf.mxu0 }
 0x138   : > { %1685 = vst [vmem:[%s3502_s8 + $0x10] sm:$0xff] %v1653_v0  ;;  %v3513_v58 = vpack.c.bf16 %v1653_v0, %v1651_v63  ;;  %v1225_v56 = vadd.f32 %v1224_v25, %v1176_v49  ;;  %v2686_v49 = vld [vmem:[#allocation5 + $0x2b4] sm:$0xf] }
 0x139   : > { %v1324_v32 = vpop.f32.mrf.mxu1 }
 0x13a   : > { %v1274_v61 = vadd.f32 %v1273_v19, %v1225_v56  ;;  %v2670_v19 = vld [vmem:[#allocation5 + $0x234] sm:$0xf] }
 0x13c   : > { %v1323_v59 = vadd.f32 %v1322_v37, %v1274_v61  ;;  %v2430_v37 = vld [vmem:[#allocation5 + $0x238] sm:$0xf0] }
 0x13d   : > { %v1177_v11 = vpop.f32.mrf.mxu2  ;;  %v2433_v36 = vor.u32 %v2670_v19, %v2430_v37  ;;  %v2684_v19 = vld [vmem:[#allocation5 + $0x2a4] sm:$0xf] }
 0x13e   : > { %v1655_v50 = vmax.f32 %v1323_v59, 0.0  ;;  %v1178_v57 = vadd.f32 %v1177_v11, %v1129_v60  ;;  %v1226_v7 = vpop.f32.mrf.mxu3 }
 0x13f   : > { %v1278_v63 = vpop.f32.mrf.mxu0  ;;  %1557 = vmatpush.bf16.msrb.mxu2 %v2433_v36 }
 0x140   : > { %1687 = vst [vmem:[%s3502_s8 + $0x20] sm:$0xff] %v1655_v50  ;;  %v1227_v54 = vadd.f32 %v1226_v7, %v1178_v57  ;;  %v2668_v57 = vld [vmem:[#allocation5 + $0x224] sm:$0xf]  ;;  %v2422_v7 = vld [vmem:[#allocation5 + $0x228] sm:$0xf0] }
 0x141   : > { %v1327_v3 = vpop.f32.mrf.mxu1 }
 0x142   : > { %1375 = vmatmul.bf16.gmra.mxu2 %v3236_v42  ;;  %1473 = vmatmul.bf16.gmra.mxu0 %v3316_v20  ;;  %v1276_v31 = vadd.f32 %v1275_v51, %v1227_v54 }
 0x143   : > { %1424 = vmatmul.bf16.gmra.mxu3 %v3242_v46  ;;  %v2494_v46 = vld [vmem:[#allocation5 + $0x2b8] sm:$0xf0] }
 0x144   : > { %v1325_v39 = vadd.f32 %v1324_v32, %v1276_v31  ;;  %1522 = vmatmul.bf16.gmra.mxu1 %v3320_v22  ;;  %v2497_v56 = vor.u32 %v2686_v49, %v2494_v46  ;;  %v1134_v22 = vadd.f32 %v3450_v38, %v1085_v40  ;;  %v1088_v32 = vadd.f32 %v3465_v62, %v3371_v27  ;;  %v2703_v46 = vld [vmem:[#allocation8 + $0x38] sm:$0xff] }
 0x145   : > { %v1180_v21 = vpop.f32.mrf.mxu2  ;;  %1863 = vmatpush.bf16.msrb.mxu0 %v2703_v46 }
 0x146   : > { %v1657_v9 = vmax.f32 %v1325_v39, 0.0  ;;  %v1181_v16 = vadd.f32 %v1180_v21, %v1132_v41  ;;  %v1229_v0 = vpop.f32.mrf.mxu3  ;;  %1606 = vmatpush.bf16.msrb.mxu3 %v2497_v56 }
 0x147   : > { %v1280_v42 = vpop.f32.mrf.mxu0 }
 0x148   : > { %1689 = vst [vmem:[%s3502_s8 + $0x30] sm:$0xff] %v1657_v9  ;;  %v1230_v20 = vadd.f32 %v1229_v0, %v1181_v16  ;;  %v3527_v25 = vpack.c.bf16 %v1657_v9, %v1655_v50  ;;  %v1137_v50 = vadd.f32 %v3473_v47, %v1088_v32 }
 0x149   : > { %v1329_v51 = vpop.f32.mrf.mxu1 }
 0x14a   : > { %v1279_v26 = vadd.f32 %v1278_v63, %v1230_v20  ;;  %v2425_v63 = vor.u32 %v2668_v57, %v2422_v7 }
 0x14c   : > { %v1328_v6 = vadd.f32 %v1327_v3, %v1279_v26  ;;  %v1090_v3 = vadd.f32 %v3480_v15, %v3371_v27  ;;  %1558 = vmatpush.bf16.msrb.mxu2 %v2425_v63 }
 0x14d   : > { %v1182_v18 = vpop.f32.mrf.mxu2 }
 0x14e   : > { %v1659_v34 = vmax.f32 %v1328_v6, 0.0  ;;  %v1183_v60 = vadd.f32 %v1182_v18, %v1134_v22  ;;  %v1231_v61 = vpop.f32.mrf.mxu3 }
 0x14f   : > { %v1283_v59 = vpop.f32.mrf.mxu0 }
 0x150   : > { %1691 = vst [vmem:[%s3502_s8 + $0x40] sm:$0xff] %v1659_v34  ;;  %v1232_v11 = vadd.f32 %v1231_v61, %v1183_v60  ;;  %v2682_v60 = vld [vmem:[#allocation5 + $0x294] sm:$0xf]  ;;  %v2478_v61 = vld [vmem:[#allocation5 + $0x298] sm:$0xf0] }
 0x151   : > { %v1332_v23 = vpop.f32.mrf.mxu1 }
 0x152   : > { %1380 = vmatmul.bf16.gmra.mxu2 %v3256_v14  ;;  %1478 = vmatmul.bf16.gmra.mxu0 %v3336_v45  ;;  %v1281_v38 = vadd.f32 %v1280_v42, %v1232_v11 }
 0x153   : > { %1429 = vmatmul.bf16.gmra.mxu3 %v3262_v17  ;;  %v2486_v17 = vld [vmem:[#allocation5 + $0x2a8] sm:$0xf0] }
 0x154   : > { %v1330_v62 = vadd.f32 %v1329_v51, %v1281_v38  ;;  %1527 = vmatmul.bf16.gmra.mxu1 %v3340_v48  ;;  %v2489_v36 = vor.u32 %v2684_v19, %v2486_v17  ;;  %v1139_v48 = vadd.f32 %v3484_v8, %v1090_v3  ;;  %v2666_v8 = vld [vmem:[#allocation5 + $0x214] sm:$0xf]  ;;  %v2414_v51 = vld [vmem:[#allocation5 + $0x218] sm:$0xf0] }
 0x155   : > { %v1185_v54 = vpop.f32.mrf.mxu2  ;;  %v2417_v22 = vor.u32 %v2666_v8, %v2414_v51 }
 0x156   : > { %v1661_v41 = vmax.f32 %v1330_v62, 0.0  ;;  %v1186_v47 = vadd.f32 %v1185_v54, %v1137_v50  ;;  %v1234_v31 = vpop.f32.mrf.mxu3  ;;  %1607 = vmatpush.bf16.msrb.mxu3 %v2489_v36  ;;  %v2700_v62 = vld [vmem:[#allocation8 + $0x20] sm:$0xff] }
 0x157   : > { %v1285_v14 = vpop.f32.mrf.mxu0  ;;  %1559 = vmatpush.bf16.msrb.mxu2 %v2417_v22 }
 0x158   : > { %1693 = vst [vmem:[%s3502_s8 + $0x50] sm:$0xff] %v1661_v41  ;;  %v1235_v45 = vadd.f32 %v1234_v31, %v1186_v47  ;;  %v3541_v37 = vpack.c.bf16 %v1661_v41, %v1659_v34  ;;  %v2699_v47 = vld [vmem:[#allocation8 + $0x18] sm:$0xff]  ;;  %v2664_v31 = vld [vmem:[#allocation5 + $0x204] sm:$0xf] }
 0x159   : > { %v1334_v39 = vpop.f32.mrf.mxu1 }
 0x15a   : > { %v1284_v21 = vadd.f32 %v1283_v59, %v1235_v45 }
 0x15c   : > { %v1333_v40 = vadd.f32 %v1332_v23, %v1284_v21  ;;  %v2701_v23 = vld [vmem:[#allocation8 + $0x28] sm:$0xff]  ;;  %v2680_v21 = vld [vmem:[#allocation5 + $0x284] sm:$0xf] }
 0x15d   : > { %v1187_v27 = vpop.f32.mrf.mxu2 }
 0x15e   : > { %v1663_v15 = vmax.f32 %v1333_v40, 0.0  ;;  %v1188_v9 = vadd.f32 %v1187_v27, %v1139_v48  ;;  %v1236_v16 = vpop.f32.mrf.mxu3  ;;  %v2470_v40 = vld [vmem:[#allocation5 + $0x288] sm:$0xf0] }
 0x15f   : > { %v1288_v0 = vpop.f32.mrf.mxu0 }
 0x160   : > { %1695 = vst [vmem:[%s3502_s8 + $0x60] sm:$0xff] %v1663_v15  ;;  %v1237_v42 = vadd.f32 %v1236_v16, %v1188_v9  ;;  %v2697_v9 = vld [vmem:[#allocation8 + $0x8] sm:$0xff] }
 0x161   : > { %v1337_v20 = vpop.f32.mrf.mxu1 }
 0x162   : > { %1385 = vmatmul.bf16.gmra.mxu2 %v3198_v1  ;;  %1483 = vmatmul.bf16.gmra.mxu0 %v3356_v12  ;;  %v1286_v49 = vadd.f32 %v1285_v14, %v1237_v42  ;;  %v2702_v1 = vld [vmem:[#allocation8 + $0x30] sm:$0xff]  ;;  %v2406_v14 = vld [vmem:[#allocation5 + $0x208] sm:$0xf0] }
 0x163   : > { %1434 = vmatmul.bf16.gmra.mxu3 %v3200_v4  ;;  %1864 = vmatpush.bf16.msrb.mxu0 %v2702_v1 }
 0x164   : > { %v1335_v56 = vadd.f32 %v1334_v39, %v1286_v49  ;;  %1532 = vmatmul.bf16.gmra.mxu1 %v3364_v24  ;;  %v2481_v24 = vor.u32 %v2682_v60, %v2478_v61  ;;  %v2696_v49 = vld [vmem:[#allocation8] sm:$0xff] }
 0x165   : > { %v1190_v26 = vpop.f32.mrf.mxu2 }
 0x166   : > { %v1665_v6 = vmax.f32 %v1335_v56, 0.0  ;;  %v1191_v18 = vadd.f32 %v1190_v26, %v3380_v2  ;;  %v1239_v32 = vpop.f32.mrf.mxu3  ;;  %1608 = vmatpush.bf16.msrb.mxu3 %v2481_v24  ;;  %v3835_v26 = vld [vmem:[#allocation31_spill] sm:$0xff] }
 0x167   : > { %v1290_v12 = vpop.f32.mrf.mxu0  ;;  %1865 = vmatpush.bf16.msrb.mxu0 %v2701_v23 }
 0x168   : > { %1697 = vst [vmem:[%s3502_s8 + $0x70] sm:$0xff] %v1665_v6  ;;  %v1240_v34 = vadd.f32 %v1239_v32, %v1191_v18  ;;  %v3551_v4 = vpack.c.bf16 %v1665_v6, %v1663_v15  ;;  %v3836_v18 = vld [vmem:[#allocation33_spill] sm:$0xff] }
 0x169   : > { %v1339_v59 = vpop.f32.mrf.mxu1 }
 0x16a   : > { %v1289_v11 = vadd.f32 %v1288_v0, %v1240_v34 }
 0x16b   : > { %1866 = vmatpush.bf16.msrb.mxu0 %v2700_v62 }
 0x16c   : > { %v1338_v50 = vadd.f32 %v1337_v20, %v1289_v11 }
 0x16d   : > { %v1192_v2 = vpop.f32.mrf.mxu2 }
 0x16e   : > { %v1667_v38 = vmax.f32 %v1338_v50, 0.0  ;;  %v1193_v57 = vadd.f32 %v1192_v2, %v3401_v13  ;;  %v1241_v7 = vpop.f32.mrf.mxu3  ;;  %v2409_v13 = vor.u32 %v2664_v31, %v2406_v14  ;;  %v3837_v2 = vld [vmem:[#allocation15_spill] sm:$0xff]  ;;  %v2711_v14 = vld [vmem:[#allocation8 + $0x78] sm:$0xff] }
 0x16f   : > { %v1293_v63 = vpop.f32.mrf.mxu0  ;;  %1867 = vmatpush.bf16.msrb.mxu0 %v2699_v47  ;;  %1912 = vmatpush.bf16.msrb.mxu1 %v2711_v14  ;;  %v3848_v14 = vld [vmem:[#allocation23_spill] sm:$0xff] }
 0x170   : > { %1699 = vst [vmem:[%s3502_s8 + $0x80] sm:$0xff] %v1667_v38  ;;  %v1242_v54 = vadd.f32 %v1241_v7, %v1193_v57  ;;  %1560 = vmatpush.bf16.msrb.mxu2 %v2409_v13  ;;  %v3838_v57 = vld [vmem:[#allocation16_spill] sm:$0xff] }
 0x171   : > { %v1342_v3 = vpop.f32.mrf.mxu1 }
 0x172   : > { %1390 = vmatmul.bf16.gmra.mxu2 %v3218_v52  ;;  %1488 = vmatmul.bf16.gmra.mxu0 %v3393_v53  ;;  %v1291_v41 = vadd.f32 %v1290_v12, %v1242_v54  ;;  %v2698_v52 = vld [vmem:[#allocation8 + $0x10] sm:$0xff]  ;;  %v3839_v54 = vld [vmem:[#allocation36_spill] sm:$0xff] }
 0x173   : > { %1439 = vmatmul.bf16.gmra.mxu3 %v3220_v55  ;;  %1868 = vmatpush.bf16.msrb.mxu0 %v2698_v52 }
 0x174   : > { %v1340_v45 = vadd.f32 %v1339_v59, %v1291_v41  ;;  %1537 = vmatmul.bf16.gmra.mxu1 %v3399_v5  ;;  %v2473_v5 = vor.u32 %v2680_v21, %v2470_v40  ;;  %v3841_v21 = vld [vmem:[#allocation17_spill] sm:$0xff] }
 0x175   : > { %v1195_v19 = vpop.f32.mrf.mxu2 }
 0x176   : > { %v1669_v17 = vmax.f32 %v1340_v45, 0.0  ;;  %v1196_v39 = vadd.f32 %v1195_v19, %v3414_v29  ;;  %v1244_v36 = vpop.f32.mrf.mxu3  ;;  %1609 = vmatpush.bf16.msrb.mxu3 %v2473_v5 }
 0x177   : > { %v1295_v53 = vpop.f32.mrf.mxu0  ;;  %1869 = vmatpush.bf16.msrb.mxu0 %v2697_v9 }
 0x178   : > { %1701 = vst [vmem:[%s3502_s8 + $0x90] sm:$0xff] %v1669_v17  ;;  %v1245_v48 = vadd.f32 %v1244_v36, %v1196_v39  ;;  %v3561_v55 = vpack.c.bf16 %v1669_v17, %v1667_v38  ;;  %v3840_v39 = vld [vmem:[#allocation37_spill] sm:$0xff] }
 0x179   : > { %v1344_v27 = vpop.f32.mrf.mxu1 }
 0x17a   : > { %v1294_v15 = vadd.f32 %v1293_v63, %v1245_v48 }
 0x17b   : > { %1870 = vmatpush.bf16.msrb.mxu0 %v2696_v49 }
 0x17c   : > { %v1343_v16 = vadd.f32 %v1342_v3, %v1294_v15  ;;  %v3843_v15 = vld [vmem:[#allocation18_spill] sm:$0xff] }
 0x17d   : > { %v1197_v29 = vpop.f32.mrf.mxu2 }
 0x17e   : > { %v1671_v0 = vmax.f32 %v1343_v16, 0.0  ;;  %v1198_v42 = vadd.f32 %v1197_v29, %v3435_v33  ;;  %v1246_v20 = vpop.f32.mrf.mxu3 }
 0x17f   : > { %v1298_v46 = vpop.f32.mrf.mxu0 }
 0x180   : > { %1703 = vst [vmem:[%s3502_s8 + $0xa0] sm:$0xff] %v1671_v0  ;;  %v1247_v8 = vadd.f32 %v1246_v20, %v1198_v42 }
 0x181   : > { %v1347_v56 = vpop.f32.mrf.mxu1 }
 0x182   : > { %1395 = vmatmul.bf16.gmra.mxu2 %v3238_v43  ;;  %1493 = vmatmul.bf16.gmra.mxu0 %v3427_v30  ;;  %v1296_v51 = vadd.f32 %v1295_v53, %v1247_v8 }
 0x183   : > { %1444 = vmatmul.bf16.gmra.mxu3 %v3240_v44 }
 0x184   : > { %v1345_v22 = vadd.f32 %v1344_v27, %v1296_v51  ;;  %1542 = vmatmul.bf16.gmra.mxu1 %v3835_v26  ;;  %v3842_v27 = vld [vmem:[#allocation26_spill] sm:$0xff] }
 0x185   : > { %v1200_v6 = vpop.f32.mrf.mxu2  ;;  %v3588_v5 = vperm.slane %v3842_v27, 1 }
 0x186   : > { %v1673_v33 = vmax.f32 %v1345_v22, 0.0  ;;  %v1201_v32 = vadd.f32 %v1200_v6, %v3836_v18  ;;  %v1249_v1 = vpop.f32.mrf.mxu3 }
 0x187   : > { %v1300_v12 = vpop.f32.mrf.mxu0 }
 0x188   : > { %1705 = vst [vmem:[%s3502_s8 + $0xb0] sm:$0xff] %v1673_v33  ;;  %v1250_v34 = vadd.f32 %v1249_v1, %v1201_v32  ;;  %v3571_v60 = vpack.c.bf16 %v1673_v33, %v1671_v0  ;;  %v3844_v33 = vld [vmem:[#allocation19_spill] sm:$0xff]  ;;  %v3845_v32 = vld [vmem:[#allocation20_spill] sm:$0xff] }
 0x189   : > { %v1349_v59 = vpop.f32.mrf.mxu1 }
 0x18a   : > { %v1299_v43 = vadd.f32 %v1298_v46, %v1250_v34  ;;  %v2710_v46 = vld [vmem:[#allocation8 + $0x70] sm:$0xff] }
 0x18b   : > { %1913 = vmatpush.bf16.msrb.mxu1 %v2710_v46 }
 0x18c   : > { %v1348_v30 = vadd.f32 %v1347_v56, %v1299_v43 }
 0x18d   : > { %v1202_v61 = vpop.f32.mrf.mxu2 }
 0x18e   : > { %v1675_v44 = vmax.f32 %v1348_v30, 0.0  ;;  %v1203_v24 = vadd.f32 %v1202_v61, %v3469_v35  ;;  %v1251_v11 = vpop.f32.mrf.mxu3  ;;  %v2709_v30 = vld [vmem:[#allocation8 + $0x68] sm:$0xff] }
 0x18f   : > { %v1303_v23 = vpop.f32.mrf.mxu0  ;;  %1914 = vmatpush.bf16.msrb.mxu1 %v2709_v30 }
 0x190   : > { %1707 = vst [vmem:[%s3502_s8 + $0xc0] sm:$0xff] %v1675_v44  ;;  %v1252_v50 = vadd.f32 %v1251_v11, %v1203_v24 }
 0x191   : > { %v1352_v47 = vpop.f32.mrf.mxu1 }
 0x192   : > { %1400 = vmatmul.bf16.gmra.mxu2 %v3837_v2  ;;  %1498 = vmatmul.bf16.gmra.mxu0 %v3461_v10  ;;  %v1301_v38 = vadd.f32 %v1300_v12, %v1252_v50 }
 0x193   : > { %1449 = vmatmul.bf16.gmra.mxu3 %v3838_v57 }
 0x194   : > { %v1350_v7 = vadd.f32 %v1349_v59, %v1301_v38  ;;  %1547 = vmatmul.bf16.gmra.mxu1 %v3467_v28  ;;  %v3847_v38 = vld [vmem:[#allocation22_spill] sm:$0xff] }
 0x195   : > { %v1205_v62 = vpop.f32.mrf.mxu2 }
 0x196   : > { %v1677_v63 = vmax.f32 %v1350_v7, 0.0  ;;  %v1206_v3 = vadd.f32 %v1205_v62, %v3839_v54  ;;  %v1254_v35 = vpop.f32.mrf.mxu3  ;;  %v2708_v54 = vld [vmem:[#allocation8 + $0x60] sm:$0xff] }
 0x197   : > { %v1305_v41 = vpop.f32.mrf.mxu0  ;;  %1915 = vmatpush.bf16.msrb.mxu1 %v2708_v54 }
 0x198   : > { %1709 = vst [vmem:[%s3502_s8 + $0xd0] sm:$0xff] %v1677_v63  ;;  %v1255_v31 = vadd.f32 %v1254_v35, %v1206_v3  ;;  %v3581_v45 = vpack.c.bf16 %v1677_v63, %v1675_v44 }
 0x199   : > { %v1354_v48 = vpop.f32.mrf.mxu1 }
 0x19a   : > { %v1304_v10 = vadd.f32 %v1303_v23, %v1255_v31 }
 0x19c   : > { %v1353_v13 = vadd.f32 %v1352_v47, %v1304_v10 }
 0x19d   : > { %v1207_v19 = vpop.f32.mrf.mxu2 }
 0x19e   : > { %v1679_v17 = vmax.f32 %v1353_v13, 0.0  ;;  %v1208_v28 = vadd.f32 %v1207_v19, %v3840_v39  ;;  %v1256_v36 = vpop.f32.mrf.mxu3  ;;  %v3849_v13 = vld [vmem:[#allocation24_spill] sm:$0xff] }
 0x19f   : > { %v1464_v52 = vpop.f32.mrf.mxu0 }
 0x1a0   : > { %1711 = vst [vmem:[%s3502_s8 + $0xe0] sm:$0xff] %v1679_v17  ;;  %v1257_v53 = vadd.f32 %v1256_v36, %v1208_v28 }
 0x1a2   : > { %1561 = vmatmul.bf16.vlgmr.msrb.gmra.mxu2 %v3841_v21  ;;  %1871 = vmatmul.bf16.vlgmr.msrb.gmra.mxu0 %v3513_v58  ;;  %v1306_v40 = vadd.f32 %v1305_v41, %v1257_v53 }
 0x1a3   : > { %1610 = vmatmul.bf16.vlgmr.msrb.gmra.mxu3 %v3843_v15  ;;  %v3850_v15 = vld [vmem:[#allocation25_spill] sm:$0xff] }
 0x1a4   : > { %v1355_v9 = vadd.f32 %v1354_v48, %v1306_v40 }
 0x1a5   : > { %v1366_v16 = vpop.f32.mrf.mxu2 }
 0x1a6   : > { %v1681_v29 = vmax.f32 %v1355_v9, 0.0  ;;  %v1367_v0 = vadd.f32 %v1366_v16, %v3588_v5  ;;  %v1415_v42 = vpop.f32.mrf.mxu3  ;;  %v3851_v16 = vld [vmem:[#allocation27_spill] sm:$0xff] }
 0x1a7   : > { %v1466_v20 = vpop.f32.mrf.mxu0 }
 0x1a8   : > { %1713 = vst [vmem:[%s3502_s8 + $0xf0] sm:$0xff] %v1681_v29  ;;  %v1416_v49 = vadd.f32 %v1415_v42, %v1367_v0  ;;  %v3593_v8 = vpack.c.bf16 %v1681_v29, %v1679_v17 }
 0x1aa   : > { %v3595_v51 = vadd.f32 %v1464_v52, %v1416_v49  ;;  %v2707_v52 = vld [vmem:[#allocation8 + $0x58] sm:$0xff]  ;;  %v2706_v49 = vld [vmem:[#allocation8 + $0x50] sm:$0xff] }
 0x1ab   : > { %1916 = vmatpush.bf16.msrb.mxu1 %v2707_v52 }
 0x1ad   : > { %v1368_v58 = vpop.f32.mrf.mxu2 }
 0x1ae   : > { %v1369_v56 = vadd.f32 %v1368_v58, %v3588_v5  ;;  %v1417_v22 = vpop.f32.mrf.mxu3 }
 0x1af   : > { %v1469_v26 = vpop.f32.mrf.mxu0  ;;  %1917 = vmatpush.bf16.msrb.mxu1 %v2706_v49 }
 0x1b0   : > { %v1418_v6 = vadd.f32 %v1417_v22, %v1369_v56 }
 0x1b2   : > { %1566 = vmatmul.bf16.gmra.mxu2 %v3844_v33  ;;  %1876 = vmatmul.bf16.gmra.mxu0 %v3527_v25  ;;  %v3600_v18 = vadd.f32 %v1466_v20, %v1418_v6  ;;  %v3846_v25 = vld [vmem:[#allocation21_spill] sm:$0xff] }
 0x1b3   : > { %1615 = vmatmul.bf16.gmra.mxu3 %v3845_v32 }
 0x1b5   : > { %v1371_v1 = vpop.f32.mrf.mxu2 }
 0x1b6   : > { %v1372_v12 = vadd.f32 %v1371_v1, %v3588_v5  ;;  %v1420_v34 = vpop.f32.mrf.mxu3 }
 0x1b7   : > { %v1471_v61 = vpop.f32.mrf.mxu0 }
 0x1b8   : > { %v1421_v43 = vadd.f32 %v1420_v34, %v1372_v12  ;;  %v2705_v12 = vld [vmem:[#allocation8 + $0x48] sm:$0xff] }
 0x1b9   : > { %1918 = vmatpush.bf16.msrb.mxu1 %v2705_v12 }
 0x1ba   : > { %v3604_v59 = vadd.f32 %v1469_v26, %v1421_v43  ;;  %v3852_v26 = vld [vmem:[#allocation28_spill] sm:$0xff] }
 0x1bd   : > { %v1373_v44 = vpop.f32.mrf.mxu2 }
 0x1be   : > { %v1374_v24 = vadd.f32 %v1373_v44, %v3588_v5  ;;  %v1422_v11 = vpop.f32.mrf.mxu3  ;;  %v3854_v44 = vld [vmem:[#allocation30_spill] sm:$0xff] }
 0x1bf   : > { %v1474_v2 = vpop.f32.mrf.mxu0 }
 0x1c0   : > { %v1423_v23 = vadd.f32 %v1422_v11, %v1374_v24  ;;  %v3855_v24 = vld [vmem:[#allocation32_spill] sm:$0xff] }
 0x1c2   : > { %1571 = vmatmul.bf16.gmra.mxu2 %v3846_v25  ;;  %1881 = vmatmul.bf16.gmra.mxu0 %v3541_v37  ;;  %v3609_v50 = vadd.f32 %v1471_v61, %v1423_v23 }
 0x1c3   : > { %1620 = vmatmul.bf16.gmra.mxu3 %v3847_v38  ;;  %v2704_v38 = vld [vmem:[#allocation8 + $0x40] sm:$0xff] }
 0x1c4   : > { %1919 = vmatpush.bf16.msrb.mxu1 %v2704_v38 }
 0x1c5   : > { %v1376_v57 = vpop.f32.mrf.mxu2 }
 0x1c6   : > { %v1377_v7 = vadd.f32 %v1376_v57, %v3588_v5  ;;  %v1425_v62 = vpop.f32.mrf.mxu3 }
 0x1c7   : > { %v1476_v35 = vpop.f32.mrf.mxu0 }
 0x1c8   : > { %v1426_v63 = vadd.f32 %v1425_v62, %v1377_v7 }
 0x1ca   : > { %v3613_v3 = vadd.f32 %v1474_v2, %v1426_v63 }
 0x1cd   : > { %v1378_v41 = vpop.f32.mrf.mxu2 }
 0x1ce   : > { %v1379_v47 = vadd.f32 %v1378_v41, %v3588_v5  ;;  %v1427_v31 = vpop.f32.mrf.mxu3 }
 0x1cf   : > { %v1479_v28 = vpop.f32.mrf.mxu0 }
 0x1d0   : > { %v1428_v37 = vadd.f32 %v1427_v31, %v1379_v47 }
 0x1d2   : > { %1576 = vmatmul.bf16.gmra.mxu2 %v3848_v14  ;;  %1886 = vmatmul.bf16.gmra.mxu0 %v3551_v4  ;;  %v3618_v10 = vadd.f32 %v1476_v35, %v1428_v37  ;;  %v3856_v35 = vld [vmem:[#allocation34_spill] sm:$0xff] }
 0x1d3   : > { %1625 = vmatmul.bf16.gmra.mxu3 %v3849_v13 }
 0x1d5   : > { %v1381_v19 = vpop.f32.mrf.mxu2 }
 0x1d6   : > { %v1382_v17 = vadd.f32 %v1381_v19, %v3588_v5  ;;  %v1430_v39 = vpop.f32.mrf.mxu3 }
 0x1d7   : > { %v1481_v4 = vpop.f32.mrf.mxu0 }
 0x1d8   : > { %v1431_v36 = vadd.f32 %v1430_v39, %v1382_v17 }
 0x1da   : > { %v3622_v53 = vadd.f32 %v1479_v28, %v1431_v36 }
 0x1dd   : > { %v1383_v48 = vpop.f32.mrf.mxu2 }
 0x1de   : > { %v1384_v21 = vadd.f32 %v1383_v48, %v3588_v5  ;;  %v1432_v40 = vpop.f32.mrf.mxu3 }
 0x1e0   : > { %v1433_v27 = vadd.f32 %v1432_v40, %v1384_v21 }
 0x1e2   : > { %1581 = vmatmul.bf16.gmra.mxu2 %v3850_v15  ;;  %1891 = vmatmul.bf16.gmra.mxu0 %v3561_v55  ;;  %v3627_v9 = vadd.f32 %v1481_v4, %v1433_v27  ;;  %v3853_v55 = vld [vmem:[#allocation29_spill] sm:$0xff] }
 0x1e3   : > { %1630 = vmatmul.bf16.gmra.mxu3 %v3851_v16 }
 0x1e5   : > { %v1386_v29 = vpop.f32.mrf.mxu2 }
 0x1e6   : > { %v1387_v0 = vadd.f32 %v1386_v29, %v3588_v5  ;;  %v1435_v42 = vpop.f32.mrf.mxu3 }
 0x1e8   : > { %v3631_v20 = vadd.f32 %v1435_v42, %v1387_v0 }
 0x1ed   : > { %v1388_v46 = vpop.f32.mrf.mxu2 }
 0x1ee   : > { %v1389_v58 = vadd.f32 %v1388_v46, %v3588_v5  ;;  %v1437_v56 = vpop.f32.mrf.mxu3 }
 0x1f0   : > { %v3634_v22 = vadd.f32 %v1437_v56, %v1389_v58 }
 0x1f2   : > { %1586 = vmatmul.bf16.gmra.mxu2 %v3852_v26  ;;  %1896 = vmatmul.bf16.gmra.mxu0 %v3571_v60  ;;  %v1513_v60 = vpop.f32.mrf.mxu1 }
 0x1f3   : > { %1635 = vmatmul.bf16.gmra.mxu3 %v3853_v55 }
 0x1f5   : > { %v1391_v6 = vpop.f32.mrf.mxu2 }
 0x1f6   : > { %v1392_v33 = vadd.f32 %v1391_v6, %v3588_v5  ;;  %v1440_v32 = vpop.f32.mrf.mxu3 }
 0x1f8   : > { %v3640_v1 = vadd.f32 %v1440_v32, %v1392_v33 }
 0x1fa   : > { %v1515_v57 = vpop.f32.mrf.mxu1 }
 0x1fb   : > { %v1516_v4 = vadd.f32 %v1515_v57, %v3600_v18 }
 0x1fd   : > { %v1393_v34 = vpop.f32.mrf.mxu2 }
 0x1fe   : > { %v1394_v43 = vadd.f32 %v1393_v34, %v3588_v5  ;;  %v1442_v30 = vpop.f32.mrf.mxu3 }
 0x200   : > { %v3643_v61 = vadd.f32 %v1442_v30, %v1394_v43 }
 0x202   : > { %1591 = vmatmul.bf16.gmra.mxu2 %v3854_v44  ;;  %1901 = vmatmul.bf16.gmra.mxu0 %v3581_v45  ;;  %v3857_v45 = vld [vmem:[#allocation35_spill] sm:$0xff]  ;;  %v1518_v37 = vpop.f32.mrf.mxu1 }
 0x203   : > { %1640 = vmatmul.bf16.gmra.mxu3 %v3855_v24  ;;  %v1519_v42 = vadd.f32 %v1518_v37, %v3604_v59  ;;  %v1484_v59 = vpop.f32.mrf.mxu0 }
 0x205   : > { %v1396_v11 = vpop.f32.mrf.mxu2 }
 0x206   : > { %v1397_v23 = vadd.f32 %v1396_v11, %v3588_v5  ;;  %v1445_v25 = vpop.f32.mrf.mxu3 }
 0x208   : > { %v3649_v2 = vadd.f32 %v1445_v25, %v1397_v23 }
 0x20a   : > { %v1520_v28 = vpop.f32.mrf.mxu1 }
 0x20b   : > { %v1521_v18 = vadd.f32 %v1520_v28, %v3609_v50  ;;  %v1486_v38 = vpop.f32.mrf.mxu0 }
 0x20d   : > { %v1398_v7 = vpop.f32.mrf.mxu2 }
 0x20e   : > { %v1399_v62 = vadd.f32 %v1398_v7, %v3588_v5  ;;  %v1447_v63 = vpop.f32.mrf.mxu3 }
 0x210   : > { %v3652_v54 = vadd.f32 %v1447_v63, %v1399_v62 }
 0x212   : > { %1596 = vmatmul.bf16.gmra.mxu2 %v3856_v35  ;;  %1906 = vmatmul.bf16.gmra.mxu0 %v3593_v8  ;;  %v1514_v8 = vadd.f32 %v1513_v60, %v3595_v51  ;;  %v1523_v27 = vpop.f32.mrf.mxu1 }
 0x213   : > { %1645 = vmatmul.bf16.gmra.mxu3 %v3857_v45  ;;  %v1524_v30 = vadd.f32 %v1523_v27, %v3613_v3 }
 0x215   : > { %v1401_v41 = vpop.f32.mrf.mxu2 }
 0x216   : > { %v1402_v47 = vadd.f32 %v1401_v41, %v3588_v5  ;;  %v1450_v31 = vpop.f32.mrf.mxu3 }
 0x218   : > { %v3658_v14 = vadd.f32 %v1450_v31, %v1402_v47  ;;  %v1489_v31 = vpop.f32.mrf.mxu0 }
 0x21a   : > { %v1525_v51 = vpop.f32.mrf.mxu1 }
 0x21b   : > { %v1526_v57 = vadd.f32 %v1525_v51, %v3618_v10 }
 0x21d   : > { %v1403_v13 = vpop.f32.mrf.mxu2 }
 0x21e   : > { %v1404_v19 = vadd.f32 %v1403_v13, %v3588_v5  ;;  %v1452_v17 = vpop.f32.mrf.mxu3 }
 0x220   : > { %v3661_v39 = vadd.f32 %v1452_v17, %v1404_v19 }
 0x222   : > { %v1528_v12 = vpop.f32.mrf.mxu1 }
 0x223   : > { %v1529_v41 = vadd.f32 %v1528_v12, %v3622_v53  ;;  %v1485_v53 = vadd.f32 %v1484_v59, %v3631_v20 }
 0x225   : > { %v1562_v36 = vpop.f32.mrf.mxu2 }
 0x226   : > { %v1563_v52 = vadd.f32 %v1562_v36, %v1514_v8  ;;  %v1611_v48 = vpop.f32.mrf.mxu3 }
 0x228   : > { %v1612_v21 = vadd.f32 %v1611_v48, %v1563_v52 }
 0x22a   : > { %v1652_v40 = vmax.f32 %v1612_v21, 0.0  ;;  %v1530_v50 = vpop.f32.mrf.mxu1  ;;  %v1491_v21 = vpop.f32.mrf.mxu0 }
 0x22b   : > { %v1531_v28 = vadd.f32 %v1530_v50, %v3627_v9  ;;  %v1487_v9 = vadd.f32 %v1486_v38, %v3634_v22 }
 0x22c   : > { %1684 = vst [vmem:[%s3502_s8 + $0x8] sm:$0xff] %v1652_v40 }
 0x22d   : > { %v1564_v15 = vpop.f32.mrf.mxu2 }
 0x22e   : > { %v1565_v16 = vadd.f32 %v1564_v15, %v1516_v4  ;;  %v1613_v5 = vpop.f32.mrf.mxu3 }
 0x230   : > { %v1614_v29 = vadd.f32 %v1613_v5, %v1565_v16 }
 0x232   : > { %v1654_v0 = vmax.f32 %v1614_v29, 0.0  ;;  %v1533_v45 = vpop.f32.mrf.mxu1 }
 0x233   : > { %v1534_v4 = vadd.f32 %v1533_v45, %v1485_v53 }
 0x234   : > { %1686 = vst [vmem:[%s3502_s8 + $0x18] sm:$0xff] %v1654_v0  ;;  %v1716_v49 = vpack.c.bf16 %v1654_v0, %v1652_v40 }
 0x235   : > { %v1567_v46 = vpop.f32.mrf.mxu2 }
 0x236   : > { %v1568_v58 = vadd.f32 %v1567_v46, %v1519_v42  ;;  %v1616_v56 = vpop.f32.mrf.mxu3  ;;  %1920 = vmatmul.bf16.vlgmr.msrb.gmra.mxu1 %v1716_v49  ;;  %v1494_v49 = vpop.f32.mrf.mxu0 }
 0x238   : > { %v1617_v26 = vadd.f32 %v1616_v56, %v1568_v58 }
 0x23a   : > { %v1656_v55 = vmax.f32 %v1617_v26, 0.0  ;;  %v1535_v8 = vpop.f32.mrf.mxu1  ;;  %v1490_v26 = vadd.f32 %v1489_v31, %v3640_v1 }
 0x23b   : > { %v1536_v46 = vadd.f32 %v1535_v8, %v1487_v9 }
 0x23c   : > { %1688 = vst [vmem:[%s3502_s8 + $0x28] sm:$0xff] %v1656_v55 }
 0x23d   : > { %v1569_v6 = vpop.f32.mrf.mxu2 }
 0x23e   : > { %v1570_v33 = vadd.f32 %v1569_v6, %v1521_v18  ;;  %v1618_v32 = vpop.f32.mrf.mxu3 }
 0x240   : > { %v1619_v34 = vadd.f32 %v1618_v32, %v1570_v33  ;;  %v1496_v33 = vpop.f32.mrf.mxu0 }
 0x242   : > { %v1658_v43 = vmax.f32 %v1619_v34, 0.0  ;;  %v1538_v0 = vpop.f32.mrf.mxu1 }
 0x243   : > { %v1539_v32 = vadd.f32 %v1538_v0, %v1490_v26 }
 0x244   : > { %1690 = vst [vmem:[%s3502_s8 + $0x38] sm:$0xff] %v1658_v43  ;;  %v1718_v44 = vpack.c.bf16 %v1658_v43, %v1656_v55  ;;  %v1492_v43 = vadd.f32 %v1491_v21, %v3643_v61 }
 0x245   : > { %v1572_v60 = vpop.f32.mrf.mxu2 }
 0x246   : > { %v1573_v24 = vadd.f32 %v1572_v60, %v1524_v30  ;;  %v1621_v11 = vpop.f32.mrf.mxu3  ;;  %1925 = vmatmul.bf16.gmra.mxu1 %v1718_v44 }
 0x248   : > { %v1622_v23 = vadd.f32 %v1621_v11, %v1573_v24  ;;  %v1499_v1 = vpop.f32.mrf.mxu0 }
 0x24a   : > { %v1660_v25 = vmax.f32 %v1622_v23, 0.0  ;;  %v1540_v18 = vpop.f32.mrf.mxu1 }
 0x24b   : > { %v1541_v24 = vadd.f32 %v1540_v18, %v1492_v43 }
 0x24c   : > { %1692 = vst [vmem:[%s3502_s8 + $0x48] sm:$0xff] %v1660_v25 }
 0x24d   : > { %v1574_v7 = vpop.f32.mrf.mxu2 }
 0x24e   : > { %v1575_v62 = vadd.f32 %v1574_v7, %v1526_v57  ;;  %v1623_v63 = vpop.f32.mrf.mxu3 }
 0x250   : > { %v1624_v35 = vadd.f32 %v1623_v63, %v1575_v62  ;;  %v1501_v45 = vpop.f32.mrf.mxu0 }
 0x252   : > { %v1662_v3 = vmax.f32 %v1624_v35, 0.0  ;;  %v1543_v60 = vpop.f32.mrf.mxu1 }
 0x254   : > { %1694 = vst [vmem:[%s3502_s8 + $0x58] sm:$0xff] %v1662_v3  ;;  %v1720_v47 = vpack.c.bf16 %v1662_v3, %v1660_v25  ;;  %v1495_v25 = vadd.f32 %v1494_v49, %v3649_v2 }
 0x255   : > { %v1577_v37 = vpop.f32.mrf.mxu2 }
 0x256   : > { %v1578_v13 = vadd.f32 %v1577_v37, %v1529_v41  ;;  %v1626_v19 = vpop.f32.mrf.mxu3  ;;  %1930 = vmatmul.bf16.gmra.mxu1 %v1720_v47  ;;  %v1544_v7 = vadd.f32 %v1543_v60, %v1495_v25  ;;  %v1497_v41 = vadd.f32 %v1496_v33, %v3652_v54 }
 0x258   : > { %v1627_v17 = vadd.f32 %v1626_v19, %v1578_v13  ;;  %v1872_v8 = vpop.f32.mrf.mxu0 }
 0x25a   : > { %v1664_v10 = vmax.f32 %v1627_v17, 0.0  ;;  %v1545_v63 = vpop.f32.mrf.mxu1 }
 0x25b   : > { %v1546_v37 = vadd.f32 %v1545_v63, %v1497_v41 }
 0x25c   : > { %1696 = vst [vmem:[%s3502_s8 + $0x68] sm:$0xff] %v1664_v10 }
 0x25d   : > { %v1579_v36 = vpop.f32.mrf.mxu2 }
 0x25e   : > { %v1580_v52 = vadd.f32 %v1579_v36, %v1531_v28  ;;  %v1628_v48 = vpop.f32.mrf.mxu3 }
 0x260   : > { %v1629_v40 = vadd.f32 %v1628_v48, %v1580_v52 }
 0x262   : > { %v1666_v27 = vmax.f32 %v1629_v40, 0.0  ;;  %v1548_v17 = vpop.f32.mrf.mxu1  ;;  %v1502_v40 = vadd.f32 %v1501_v45, %v3661_v39  ;;  %v3706_v39 = vld [vmem:[%s3779_s4] ss:$0 sm:$0xff] }
 0x264   : > { %1698 = vst [vmem:[%s3502_s8 + $0x78] sm:$0xff] %v1666_v27  ;;  %v1722_v15 = vpack.c.bf16 %v1666_v27, %v1664_v10  ;;  %v1500_v10 = vadd.f32 %v1499_v1, %v3658_v14  ;;  %v1874_v14 = vpop.f32.mrf.mxu0 }
 0x265   : > { %v1582_v16 = vpop.f32.mrf.mxu2 }
 0x266   : > { %v1583_v5 = vadd.f32 %v1582_v16, %v1534_v4  ;;  %v1631_v29 = vpop.f32.mrf.mxu3  ;;  %1935 = vmatmul.bf16.gmra.mxu1 %v1722_v15  ;;  %v1549_v52 = vadd.f32 %v1548_v17, %v1500_v10 }
 0x268   : > { %v1632_v42 = vadd.f32 %v1631_v29, %v1583_v5 }
 0x26a   : > { %v1668_v51 = vmax.f32 %v1632_v42, 0.0  ;;  %v1550_v4 = vpop.f32.mrf.mxu1 }
 0x26b   : > { %v1551_v16 = vadd.f32 %v1550_v4, %v1502_v40 }
 0x26c   : > { %1700 = vst [vmem:[%s3502_s8 + $0x88] sm:$0xff] %v1668_v51 }
 0x26d   : > { %v1584_v20 = vpop.f32.mrf.mxu2 }
 0x26e   : > { %v1585_v58 = vadd.f32 %v1584_v20, %v1536_v46  ;;  %v1633_v56 = vpop.f32.mrf.mxu3 }
 0x270   : > { %v1634_v55 = vadd.f32 %v1633_v56, %v1585_v58 }
 0x272   : > { %v1670_v6 = vmax.f32 %v1634_v55, 0.0 }
 0x274   : > { %1702 = vst [vmem:[%s3502_s8 + $0x98] sm:$0xff] %v1670_v6  ;;  %v1724_v12 = vpack.c.bf16 %v1670_v6, %v1668_v51  ;;  %v1877_v51 = vpop.f32.mrf.mxu0 }
 0x275   : > { %v1587_v34 = vpop.f32.mrf.mxu2 }
 0x276   : > { %v1588_v22 = vadd.f32 %v1587_v34, %v1539_v32  ;;  %v1636_v59 = vpop.f32.mrf.mxu3  ;;  %1940 = vmatmul.bf16.gmra.mxu1 %v1724_v12 }
 0x278   : > { %v1637_v30 = vadd.f32 %v1636_v59, %v1588_v22 }
 0x27a   : > { %v1672_v44 = vmax.f32 %v1637_v30, 0.0 }
 0x27c   : > { %1704 = vst [vmem:[%s3502_s8 + $0xa8] sm:$0xff] %v1672_v44  ;;  %v1879_v46 = vpop.f32.mrf.mxu0 }
 0x27d   : > { %v1589_v11 = vpop.f32.mrf.mxu2 }
 0x27e   : > { %v1590_v23 = vadd.f32 %v1589_v11, %v1541_v24  ;;  %v1638_v50 = vpop.f32.mrf.mxu3 }
 0x280   : > { %v1639_v38 = vadd.f32 %v1638_v50, %v1590_v23 }
 0x282   : > { %v1674_v57 = vmax.f32 %v1639_v38, 0.0 }
 0x284   : > { %1706 = vst [vmem:[%s3502_s8 + $0xb8] sm:$0xff] %v1674_v57  ;;  %v1726_v62 = vpack.c.bf16 %v1674_v57, %v1672_v44 }
 0x285   : > { %v1592_v35 = vpop.f32.mrf.mxu2 }
 0x286   : > { %v1593_v61 = vadd.f32 %v1592_v35, %v1544_v7  ;;  %v1641_v3 = vpop.f32.mrf.mxu3  ;;  %1945 = vmatmul.bf16.gmra.mxu1 %v1726_v62 }
 0x288   : > { %v1642_v47 = vadd.f32 %v1641_v3, %v1593_v61 }
 0x28a   : > { %v1676_v31 = vmax.f32 %v1642_v47, 0.0 }
 0x28c   : > { %1708 = vst [vmem:[%s3502_s8 + $0xc8] sm:$0xff] %v1676_v31 }
 0x28d   : > { %v1594_v2 = vpop.f32.mrf.mxu2 }
 0x28e   : > { %v1595_v13 = vadd.f32 %v1594_v2, %v1546_v37  ;;  %v1643_v19 = vpop.f32.mrf.mxu3 }
 0x290   : > { %v1644_v28 = vadd.f32 %v1643_v19, %v1595_v13 }
 0x292   : > { %v1678_v36 = vmax.f32 %v1644_v28, 0.0 }
 0x294   : > { %1710 = vst [vmem:[%s3502_s8 + $0xd8] sm:$0xff] %v1678_v36  ;;  %v1728_v48 = vpack.c.bf16 %v1678_v36, %v1676_v31 }
 0x295   : > { %v1597_v21 = vpop.f32.mrf.mxu2 }
 0x296   : > { %v1598_v54 = vadd.f32 %v1597_v21, %v1549_v52  ;;  %v1646_v53 = vpop.f32.mrf.mxu3  ;;  %1950 = vmatmul.bf16.gmra.mxu1 %v1728_v48 }
 0x298   : > { %v1647_v27 = vadd.f32 %v1646_v53, %v1598_v54 }
 0x29a   : > { %v1680_v15 = vmax.f32 %v1647_v27, 0.0 }
 0x29c   : > { %1712 = vst [vmem:[%s3502_s8 + $0xe8] sm:$0xff] %v1680_v15 }
 0x29d   : > { %v1599_v5 = vpop.f32.mrf.mxu2 }
 0x29e   : > { %v1600_v29 = vadd.f32 %v1599_v5, %v1551_v16  ;;  %v1648_v0 = vpop.f32.mrf.mxu3 }
 0x2a0   : > { %v1649_v9 = vadd.f32 %v1648_v0, %v1600_v29 }
 0x2a2   : > { %v1682_v42 = vmax.f32 %v1649_v9, 0.0 }
 0x2a4   : > { %1714 = vst [vmem:[%s3502_s8 + $0xf8] sm:$0xff] %v1682_v42  ;;  %v1730_v49 = vpack.c.bf16 %v1682_v42, %v1680_v15 }
 0x2a6   : > { %1955 = vmatmul.bf16.gmra.mxu1 %v1730_v49 }
 0x2a7   : > { %2966 = shalt.err (!%p2963_p12)
}
 0x2a8   : > { %s3024_s20 = smov 256   ;;  %s3025_s26 = smov 16   ;;  %v1873_v20 = vadd.f32 %v3706_v39, %v1872_v8  ;;  %v1882_v26 = vpop.f32.mrf.mxu0  ;;  %v1875_v55 = vadd.f32 %v3706_v39, %v1874_v14  ;;  %v1878_v33 = vadd.f32 %v3706_v39, %v1877_v51  ;;  %v1880_v22 = vadd.f32 %v3706_v39, %v1879_v46 }
 0x2a9   : > { %2747 = dma.vmem_to_hbm [thread:$0]  (%p3144_p7), %s2001_s13, 4096, %s2003_s11, %s1983_s17, %s3024_s20, %s3024_s20, %s3025_s26   ;;  %v1883_v44 = vadd.f32 %v3706_v39, %v1882_v26 }
 0x2aa   : > { %s3724_s12 = scalar_lea.vmem %s3780_s5, %s2145_s16 }
 0x2b0   : > { %v1884_v32 = vpop.f32.mrf.mxu0 }
 0x2b1   : > { %v1885_v11 = vadd.f32 %v3706_v39, %v1884_v32 }
 0x2b3   : > { %v1921_v58 = vpop.f32.mrf.mxu1 }
 0x2b4   : > { %v1922_v56 = vadd.f32 %v1921_v58, %v1873_v20 }
 0x2b6   : > { %1961 = vst [vmem:[%s3724_s12] sm:$0xff] %v1922_v56 }
 0x2b8   : > { %v1887_v30 = vpop.f32.mrf.mxu0 }
 0x2b9   : > { %v1888_v38 = vadd.f32 %v3706_v39, %v1887_v30 }
 0x2bb   : > { %v1923_v18 = vpop.f32.mrf.mxu1 }
 0x2bc   : > { %v1924_v6 = vadd.f32 %v1923_v18, %v1875_v55 }
 0x2be   : > { %1962 = vst [vmem:[%s3724_s12 + $0x8] sm:$0xff] %v1924_v6 }
 0x2c0   : > { %v1889_v1 = vpop.f32.mrf.mxu0 }
 0x2c1   : > { %v1890_v62 = vadd.f32 %v3706_v39, %v1889_v1 }
 0x2c3   : > { %v1926_v12 = vpop.f32.mrf.mxu1 }
 0x2c4   : > { %v1927_v34 = vadd.f32 %v1926_v12, %v1878_v33 }
 0x2c6   : > { %1963 = vst [vmem:[%s3724_s12 + $0x10] sm:$0xff] %v1927_v34 }
 0x2c8   : > { %v1892_v25 = vpop.f32.mrf.mxu0 }
 0x2c9   : > { %v1893_v3 = vadd.f32 %v3706_v39, %v1892_v25 }
 0x2cb   : > { %v1928_v59 = vpop.f32.mrf.mxu1 }
 0x2cc   : > { %v1929_v43 = vadd.f32 %v1928_v59, %v1880_v22 }
 0x2ce   : > { %1964 = vst [vmem:[%s3724_s12 + $0x18] sm:$0xff] %v1929_v43 }
 0x2d0   : > { %v1894_v63 = vpop.f32.mrf.mxu0 }
 0x2d1   : > { %v1895_v31 = vadd.f32 %v3706_v39, %v1894_v63 }
 0x2d3   : > { %v1931_v60 = vpop.f32.mrf.mxu1 }
 0x2d4   : > { %v1932_v24 = vadd.f32 %v1931_v60, %v1883_v44 }
 0x2d6   : > { %1965 = vst [vmem:[%s3724_s12 + $0x20] sm:$0xff] %v1932_v24 }
 0x2d8   : > { %v1897_v47 = vpop.f32.mrf.mxu0 }
 0x2d9   : > { %v1898_v19 = vadd.f32 %v3706_v39, %v1897_v47 }
 0x2db   : > { %v1933_v23 = vpop.f32.mrf.mxu1 }
 0x2dc   : > { %v1934_v50 = vadd.f32 %v1933_v23, %v1885_v11 }
 0x2de   : > { %1966 = vst [vmem:[%s3724_s12 + $0x28] sm:$0xff] %v1934_v50 }
 0x2e0   : > { %v1899_v13 = vpop.f32.mrf.mxu0 }
 0x2e1   : > { %v1900_v8 = vadd.f32 %v3706_v39, %v1899_v13 }
 0x2e3   : > { %v1936_v57 = vpop.f32.mrf.mxu1 }
 0x2e4   : > { %v1937_v7 = vadd.f32 %v1936_v57, %v1888_v38 }
 0x2e6   : > { %1967 = vst [vmem:[%s3724_s12 + $0x30] sm:$0xff] %v1937_v7 }
 0x2e8   : > { %v1902_v28 = vpop.f32.mrf.mxu0 }
 0x2e9   : > { %v1903_v48 = vadd.f32 %v3706_v39, %v1902_v28 }
 0x2eb   : > { %v1938_v35 = vpop.f32.mrf.mxu1 }
 0x2ec   : > { %v1939_v61 = vadd.f32 %v1938_v35, %v1890_v62 }
 0x2ee   : > { %1968 = vst [vmem:[%s3724_s12 + $0x38] sm:$0xff] %v1939_v61 }
 0x2f0   : > { %v1904_v21 = vpop.f32.mrf.mxu0 }
 0x2f1   : > { %v1905_v40 = vadd.f32 %v3706_v39, %v1904_v21 }
 0x2f3   : > { %v1941_v45 = vpop.f32.mrf.mxu1 }
 0x2f4   : > { %v1942_v41 = vadd.f32 %v1941_v45, %v1893_v3 }
 0x2f6   : > { %1969 = vst [vmem:[%s3724_s12 + $0x40] sm:$0xff] %v1942_v41 }
 0x2f8   : > { %v1907_v15 = vpop.f32.mrf.mxu0 }
 0x2f9   : > { %v1908_v14 = vadd.f32 %v3706_v39, %v1907_v15 }
 0x2fb   : > { %v1943_v37 = vpop.f32.mrf.mxu1 }
 0x2fc   : > { %v1944_v2 = vadd.f32 %v1943_v37, %v1895_v31 }
 0x2fe   : > { %1970 = vst [vmem:[%s3724_s12 + $0x48] sm:$0xff] %v1944_v2 }
 0x300   : > { %v1909_v29 = vpop.f32.mrf.mxu0 }
 0x301   : > { %v1910_v0 = vadd.f32 %v3706_v39, %v1909_v29 }
 0x303   : > { %v1946_v17 = vpop.f32.mrf.mxu1 }
 0x304   : > { %v1947_v10 = vadd.f32 %v1946_v17, %v1898_v19 }
 0x306   : > { %1971 = vst [vmem:[%s3724_s12 + $0x50] sm:$0xff] %v1947_v10 }
 0x30b   : > { %v1948_v36 = vpop.f32.mrf.mxu1 }
 0x30c   : > { %v1949_v52 = vadd.f32 %v1948_v36, %v1900_v8 }
 0x30e   : > { %1972 = vst [vmem:[%s3724_s12 + $0x58] sm:$0xff] %v1949_v52 }
 0x313   : > { %v1951_v54 = vpop.f32.mrf.mxu1 }
 0x314   : > { %v1952_v53 = vadd.f32 %v1951_v54, %v1903_v48 }
 0x316   : > { %1973 = vst [vmem:[%s3724_s12 + $0x60] sm:$0xff] %v1952_v53 }
 0x31b   : > { %v1953_v27 = vpop.f32.mrf.mxu1 }
 0x31c   : > { %v1954_v4 = vadd.f32 %v1953_v27, %v1905_v40 }
 0x31e   : > { %1974 = vst [vmem:[%s3724_s12 + $0x68] sm:$0xff] %v1954_v4 }
 0x323   : > { %v1956_v16 = vpop.f32.mrf.mxu1 }
 0x324   : > { %v1957_v5 = vadd.f32 %v1956_v16, %v1908_v14 }
 0x326   : > { %1975 = vst [vmem:[%s3724_s12 + $0x70] sm:$0xff] %v1957_v5 }
 0x32b   : > { %v1958_v9 = vpop.f32.mrf.mxu1 }
 0x32c   : > { %v1959_v42 = vadd.f32 %v1958_v9, %v1910_v0 }
 0x32e   : > { %1976 = vst [vmem:[%s3724_s12 + $0x78] sm:$0xff] %v1959_v42 }
 0x32f PF: > { %s2025_s15 = sand.u32 1, %s3001_s21   ;;  %p3858_p7 = scmp.ge.s32.totalorder %s3013_s24, 2 }
 0x330   : > { %s2026_s13 = scalar_lea.sflag [#allocation4], %s2025_s15 }
 0x331   : > { %p2764_p13 = pnand %p3858_p7, %p3096_p6 }
 0x333   : > { %p2765_p0 = pneg %p2764_p13 }
 0x335   : > { %2996 = dma.done.wait (%p2765_p0), %s2026_s13, 4096  }
 0x336   : > { %2998 = vsyncadd (%p2765_p0), %s2026_s13, 4294963200  ;;  %p22_p3 = scmp.ge.s32.totalorder %s3130_s10, 4   ;;  %s3859_s21 = smov %s3005_s22 }
 0x337   : > { %s3860_s22 = smov %s3009_s23  ;;  %s3861_s23 = smov %s3140_s14 }
 0x338   : > { %s3862_s24 = smov %s3130_s10  ;;  %24 = sbr.rel (!%p22_p3) target bundleno = 10 (0xa), region = 109 }
 0x33d   :  { %2032 = vsyncpa [#allocation3], 1 }
 0x33e   :  { %2034 = vsyncpa [#allocation3 + $0x1], 1 }
 0x33f   :  { %2035 = vsyncpa [#allocation6], 1 }
 0x340   :  { %2036 = vsyncpa [#allocation9], 1 }
 0x341   :  { %2037 = vsyncpa [#allocation4], 1 }
 0x342   :  { %2039 = vsyncpa [#allocation4 + $0x1], 1 }

</bundles_post_ra>
